<compile_context>
chip_gen: v5e
topology: v5e:2x2
jax: 0.10.0
libtpu: 0.0.40
codegen_flags: <defaults>
</compile_context>

<pallas_src>
import jax
import jax.numpy as jnp
from jax.experimental import pallas as pl
from jax.experimental.pallas import tpu as pltpu

# MLP dims from the PyTorch module
DIMS = [784, 512, 256, 128, 64, 10]
OUT_PAD = 128        # 10 padded to 128 lanes: lane-dense (unmasked) output stores
MAX_TILE_B = 512     # cap per review (v5e vreg-spill pressure past ~512 rows)

# Per-layer (in, out) as seen by the kernel (only the last out is padded)
PADDED_LAYERS = [(784, 512), (512, 256), (256, 128), (128, 64), (64, OUT_PAD)]


def _round_up(x, m):
    return ((x + m - 1) // m) * m


def _pick_tile_b(batch, max_tile=MAX_TILE_B):
    """Batch-tile size: multiple of 8 (sublane constraint), <= max_tile, and
    >=2 tiles for medium/large batches so the 'parallel' batch axis actually
    lands on both v7x TensorCores (harmless on v5e/v6e)."""
    if batch > max_tile:
        return max_tile
    if batch >= 256:
        return _round_up(pl.cdiv(batch, 2), 8)
    return _round_up(batch, 8)


def mlp_kernel(x_ref,
               w1_ref, b1_ref,
               w2_ref, b2_ref,
               w3_ref, b3_ref,
               w4_ref, b4_ref,
               w5_ref, b5_ref,
               o_ref):
    """Fused 5-layer MLP forward on one (tile_b, 784) batch tile.

    f32 input is cast to bf16 in-kernel (no wrapper pre-pass); all matmuls use
    bf16 operands with f32 accumulation; bias add + ReLU in f32; final layer
    has no ReLU and stores a lane-dense (tile_b, 128) bf16 block.
    """
    h = x_ref[...].astype(jnp.bfloat16)

    h = jnp.dot(h, w1_ref[...], preferred_element_type=jnp.float32) + b1_ref[...]
    h = jnp.maximum(h, 0.0).astype(jnp.bfloat16)

    h = jnp.dot(h, w2_ref[...], preferred_element_type=jnp.float32) + b2_ref[...]
    h = jnp.maximum(h, 0.0).astype(jnp.bfloat16)

    h = jnp.dot(h, w3_ref[...], preferred_element_type=jnp.float32) + b3_ref[...]
    h = jnp.maximum(h, 0.0).astype(jnp.bfloat16)

    h = jnp.dot(h, w4_ref[...], preferred_element_type=jnp.float32) + b4_ref[...]
    h = jnp.maximum(h, 0.0).astype(jnp.bfloat16)

    # final layer: no ReLU; padded-to-128 output column block, bf16 store
    o_ref[...] = (jnp.dot(h, w5_ref[...], preferred_element_type=jnp.float32)
                  + b5_ref[...]).astype(o_ref.dtype)


def prepare_params(params):
    """Pad + cast raw params for the kernel.

    params: list of (W_t f32 (in, out), b f32 (1, out)).
    Returns list of (W_t bf16, b f32) with only the last layer's `out` padded
    to 128 (zero-filled, so padding contributes 0 to the extra lanes).
    """
    prepped = []
    n = len(params)
    for i, (w_t, b) in enumerate(params):
        fi, fo = w_t.shape
        fo_p = OUT_PAD if i == n - 1 else fo
        if fo_p != fo:
            w_t = jnp.zeros((fi, fo_p), jnp.float32).at[:, :fo].set(w_t)
            b = jnp.zeros((1, fo_p), jnp.float32).at[:, :fo].set(b)
        prepped.append((w_t.astype(jnp.bfloat16), b.astype(jnp.float32)))
    return prepped


def net_forward(x, padded_params, max_tile_b=MAX_TILE_B):
    """x: (B, 1, 28, 28) (or anything with 784 trailing elements per row).
    padded_params: output of prepare_params. Returns (B, 10) f32 logits."""
    B = x.shape[0]
    x2d = x.reshape(B, DIMS[0]).astype(jnp.float32)   # view-like flatten, f32 in

    tile_b = _pick_tile_b(B, max_tile_b)
    num_tiles = pl.cdiv(B, tile_b)
    b_pad = num_tiles * tile_b
    if b_pad != B:
        # only pad the ragged last tile; padded rows are sliced off below
        x2d = jnp.pad(x2d, ((0, b_pad - B), (0, 0)))

    # batch tiles indexed by the grid; weights/biases resident (block (0, 0))
    in_specs = [pl.BlockSpec((tile_b, DIMS[0]), lambda i: (i, 0))]
    flat_args = [x2d]
    for (w_t, b) in padded_params:
        flat_args.append(w_t)
        flat_args.append(b)
        in_specs.append(pl.BlockSpec(w_t.shape, lambda i: (0, 0)))
        in_specs.append(pl.BlockSpec(b.shape, lambda i: (0, 0)))

    out_shape = jax.ShapeDtypeStruct((b_pad, OUT_PAD), jnp.bfloat16)
    out_spec = pl.BlockSpec((tile_b, OUT_PAD), lambda i: (i, 0))

    # cost hint for XLA's scheduler around this custom call
    flops = 2 * b_pad * sum(fi * fo for fi, fo in PADDED_LAYERS)
    weight_bytes = sum(fi * fo * 2 + fo * 4 for fi, fo in PADDED_LAYERS)
    bytes_accessed = weight_bytes + b_pad * (DIMS[0] * 4 + OUT_PAD * 2)

    fn = pl.pallas_call(
        mlp_kernel,
        out_shape=out_shape,
        grid=(num_tiles,),
        in_specs=in_specs,
        out_specs=out_spec,
        compiler_params=pltpu.CompilerParams(
            dimension_semantics=("parallel",),   # shards batch tiles on v7x's 2 TCs
            vmem_limit_bytes=32 << 20,           # ample headroom even at tile_b=512
        ),
        cost_estimate=pl.CostEstimate(flops=flops, transcendentals=0,
                                      bytes_accessed=bytes_accessed),
    )
    out_padded = fn(*flat_args)
    return out_padded[:B, :DIMS[-1]].astype(jnp.float32)


def init_params(key):
    """Deterministic init mimicking torch.nn.Linear default
    (uniform in +/- 1/sqrt(fan_in)). Weights stored transposed: (in, out), f32."""
    params = []
    for i in range(5):
        fan_in, fan_out = DIMS[i], DIMS[i + 1]
        key, kw, kb = jax.random.split(key, 3)
        bound = 1.0 / jnp.sqrt(fan_in)
        w_t = jax.random.uniform(kw, (fan_in, fan_out), jnp.float32,
                                 minval=-bound, maxval=bound)
        b = jax.random.uniform(kb, (1, fan_out), jnp.float32,
                               minval=-bound, maxval=bound)
        params.append((w_t, b))
    return params


def reference_forward_bf16(x, padded_params):
    """Pure-JAX reference using the SAME bf16 operands / f32 accumulation /
    bf16 output rounding as the kernel (isolates kernel correctness)."""
    B = x.shape[0]
    h = x.reshape(B, DIMS[0]).astype(jnp.bfloat16)
    n = len(padded_params)
    for i, (w_t, b) in enumerate(padded_params):
        h = jnp.dot(h, w_t, preferred_element_type=jnp.float32) + b
        if i < n - 1:
            h = jnp.maximum(h, 0.0).astype(jnp.bfloat16)
    return h[:, :DIMS[-1]].astype(jnp.bfloat16).astype(jnp.float32)


def reference_forward_f32(x, raw_params):
    """Pure-f32 reference matching the original PyTorch Net numerics."""
    B = x.shape[0]
    h = x.reshape(B, DIMS[0]).astype(jnp.float32)
    n = len(raw_params)
    for i, (w_t, b) in enumerate(raw_params):
        h = jnp.dot(h, w_t) + b
        if i < n - 1:
            h = jnp.maximum(h, 0.0)
    return h


if __name__ == "__main__":
    key = jax.random.PRNGKey(0)
    key, kx = jax.random.split(key)
    # small batch of MNIST-shaped NCHW inputs
    x = jax.random.normal(kx, (8, 1, 28, 28), jnp.float32)

    raw_params = init_params(key)
    params = prepare_params(raw_params)

    out = jax.block_until_ready(net_forward(x, params))
    assert out.shape == (8, 10), out.shape

    # kernel vs bf16-matched JAX reference (tight)
    ref_bf16 = reference_forward_bf16(x, params)
    assert jnp.allclose(out, ref_bf16, atol=1e-2, rtol=1e-2), "mismatch vs bf16 reference"

    # fidelity vs the pure-f32 PyTorch-equivalent forward (loose bf16 bound)
    ref_f32 = reference_forward_f32(x, raw_params)
    max_abs_err = float(jnp.max(jnp.abs(out - ref_f32)))
    assert max_abs_err < 0.08, f"bf16 drift vs f32 reference too large: {max_abs_err}"

    print("KERNEL_OK")
</pallas_src>

<mosaic_0001>
module attributes {stable_mosaic.version = 11 : i64} {
  func.func @mlp_kernel(%arg0: i32, %arg1: memref<8x784xf32, #tpu.memory_space<vmem>>, %arg2: memref<784x512xbf16, #tpu.memory_space<vmem>>, %arg3: memref<1x512xf32, #tpu.memory_space<vmem>>, %arg4: memref<512x256xbf16, #tpu.memory_space<vmem>>, %arg5: memref<1x256xf32, #tpu.memory_space<vmem>>, %arg6: memref<256x128xbf16, #tpu.memory_space<vmem>>, %arg7: memref<1x128xf32, #tpu.memory_space<vmem>>, %arg8: memref<128x64xbf16, #tpu.memory_space<vmem>>, %arg9: memref<1x64xf32, #tpu.memory_space<vmem>>, %arg10: memref<64x128xbf16, #tpu.memory_space<vmem>>, %arg11: memref<1x128xf32, #tpu.memory_space<vmem>>, %arg12: memref<8x128xbf16, #tpu.memory_space<vmem>>) attributes {dimension_semantics = [#tpu.dimension_semantics<parallel>], iteration_bounds = array<i64: 1>, scalar_prefetch = 0 : i64, scratch_operands = 0 : i64, tpu.core_type = #tpu.core_type<tc>, window_params = [{transform_indices = @transform_0, window_bounds = array<i64: 8, 784>}, {pipeline_mode = #tpu.pipeline_mode<synchronous>, transform_indices = @transform_1, window_bounds = array<i64: 784, 512>}, {pipeline_mode = #tpu.pipeline_mode<synchronous>, transform_indices = @transform_2, window_bounds = array<i64: 1, 512>}, {pipeline_mode = #tpu.pipeline_mode<synchronous>, transform_indices = @transform_3, window_bounds = array<i64: 512, 256>}, {pipeline_mode = #tpu.pipeline_mode<synchronous>, transform_indices = @transform_4, window_bounds = array<i64: 1, 256>}, {pipeline_mode = #tpu.pipeline_mode<synchronous>, transform_indices = @transform_5, window_bounds = array<i64: 256, 128>}, {pipeline_mode = #tpu.pipeline_mode<synchronous>, transform_indices = @transform_6, window_bounds = array<i64: 1, 128>}, {pipeline_mode = #tpu.pipeline_mode<synchronous>, transform_indices = @transform_7, window_bounds = array<i64: 128, 64>}, {pipeline_mode = #tpu.pipeline_mode<synchronous>, transform_indices = @transform_8, window_bounds = array<i64: 1, 64>}, {pipeline_mode = #tpu.pipeline_mode<synchronous>, transform_indices = @transform_9, window_bounds = array<i64: 64, 128>}, {pipeline_mode = #tpu.pipeline_mode<synchronous>, transform_indices = @transform_10, window_bounds = array<i64: 1, 128>}, {transform_indices = @transform_11, window_bounds = array<i64: 8, 128>}]} {
    %c0 = arith.constant 0 : index
    %c0_0 = arith.constant 0 : index
    %0 = vector.load %arg1[%c0, %c0_0] : memref<8x784xf32, #tpu.memory_space<vmem>>, vector<8x784xf32>
    %1 = arith.truncf %0 : vector<8x784xf32> to vector<8x784xbf16>
    %c0_1 = arith.constant 0 : index
    %c0_2 = arith.constant 0 : index
    %2 = vector.load %arg2[%c0_1, %c0_2] : memref<784x512xbf16, #tpu.memory_space<vmem>>, vector<784x512xbf16>
    %cst = arith.constant dense<0.000000e+00> : vector<8x512xf32>
    %3 = tpu.matmul %1, %2, %cst {dimension_numbers = #tpu.dot_dimension_numbers<[1], [0], [0], [1], [0, 0, 1, 1], [], []>} : vector<8x784xbf16>, vector<784x512xbf16>, vector<8x512xf32> -> vector<8x512xf32>
    %c0_3 = arith.constant 0 : index
    %c0_4 = arith.constant 0 : index
    %4 = vector.load %arg3[%c0_3, %c0_4] : memref<1x512xf32, #tpu.memory_space<vmem>>, vector<1x512xf32>
    %5 = vector.broadcast %4 : vector<1x512xf32> to vector<8x512xf32>
    %6 = arith.addf %3, %5 : vector<8x512xf32>
    %cst_5 = arith.constant 0.000000e+00 : f32
    %7 = vector.broadcast %cst_5 : f32 to vector<8x512xf32>
    %8 = arith.maximumf %6, %7 : vector<8x512xf32>
    %9 = arith.truncf %8 : vector<8x512xf32> to vector<8x512xbf16>
    %c0_6 = arith.constant 0 : index
    %c0_7 = arith.constant 0 : index
    %10 = vector.load %arg4[%c0_6, %c0_7] : memref<512x256xbf16, #tpu.memory_space<vmem>>, vector<512x256xbf16>
    %cst_8 = arith.constant dense<0.000000e+00> : vector<8x256xf32>
    %11 = tpu.matmul %9, %10, %cst_8 {dimension_numbers = #tpu.dot_dimension_numbers<[1], [0], [0], [1], [0, 0, 1, 1], [], []>} : vector<8x512xbf16>, vector<512x256xbf16>, vector<8x256xf32> -> vector<8x256xf32>
    %c0_9 = arith.constant 0 : index
    %c0_10 = arith.constant 0 : index
    %12 = vector.load %arg5[%c0_9, %c0_10] : memref<1x256xf32, #tpu.memory_space<vmem>>, vector<1x256xf32>
    %13 = vector.broadcast %12 : vector<1x256xf32> to vector<8x256xf32>
    %14 = arith.addf %11, %13 : vector<8x256xf32>
    %cst_11 = arith.constant 0.000000e+00 : f32
    %15 = vector.broadcast %cst_11 : f32 to vector<8x256xf32>
    %16 = arith.maximumf %14, %15 : vector<8x256xf32>
    %17 = arith.truncf %16 : vector<8x256xf32> to vector<8x256xbf16>
    %c0_12 = arith.constant 0 : index
    %c0_13 = arith.constant 0 : index
    %18 = vector.load %arg6[%c0_12, %c0_13] : memref<256x128xbf16, #tpu.memory_space<vmem>>, vector<256x128xbf16>
    %cst_14 = arith.constant dense<0.000000e+00> : vector<8x128xf32>
    %19 = tpu.matmul %17, %18, %cst_14 {dimension_numbers = #tpu.dot_dimension_numbers<[1], [0], [0], [1], [0, 0, 1, 1], [], []>} : vector<8x256xbf16>, vector<256x128xbf16>, vector<8x128xf32> -> vector<8x128xf32>
    %c0_15 = arith.constant 0 : index
    %c0_16 = arith.constant 0 : index
    %20 = vector.load %arg7[%c0_15, %c0_16] : memref<1x128xf32, #tpu.memory_space<vmem>>, vector<1x128xf32>
    %21 = vector.broadcast %20 : vector<1x128xf32> to vector<8x128xf32>
    %22 = arith.addf %19, %21 : vector<8x128xf32>
    %cst_17 = arith.constant 0.000000e+00 : f32
    %23 = vector.broadcast %cst_17 : f32 to vector<8x128xf32>
    %24 = arith.maximumf %22, %23 : vector<8x128xf32>
    %25 = arith.truncf %24 : vector<8x128xf32> to vector<8x128xbf16>
    %c0_18 = arith.constant 0 : index
    %c0_19 = arith.constant 0 : index
    %26 = vector.load %arg8[%c0_18, %c0_19] : memref<128x64xbf16, #tpu.memory_space<vmem>>, vector<128x64xbf16>
    %cst_20 = arith.constant dense<0.000000e+00> : vector<8x64xf32>
    %27 = tpu.matmul %25, %26, %cst_20 {dimension_numbers = #tpu.dot_dimension_numbers<[1], [0], [0], [1], [0, 0, 1, 1], [], []>} : vector<8x128xbf16>, vector<128x64xbf16>, vector<8x64xf32> -> vector<8x64xf32>
    %c0_21 = arith.constant 0 : index
    %c0_22 = arith.constant 0 : index
    %28 = vector.load %arg9[%c0_21, %c0_22] : memref<1x64xf32, #tpu.memory_space<vmem>>, vector<1x64xf32>
    %29 = vector.broadcast %28 : vector<1x64xf32> to vector<8x64xf32>
    %30 = arith.addf %27, %29 : vector<8x64xf32>
    %cst_23 = arith.constant 0.000000e+00 : f32
    %31 = vector.broadcast %cst_23 : f32 to vector<8x64xf32>
    %32 = arith.maximumf %30, %31 : vector<8x64xf32>
    %33 = arith.truncf %32 : vector<8x64xf32> to vector<8x64xbf16>
    %c0_24 = arith.constant 0 : index
    %c0_25 = arith.constant 0 : index
    %34 = vector.load %arg10[%c0_24, %c0_25] : memref<64x128xbf16, #tpu.memory_space<vmem>>, vector<64x128xbf16>
    %cst_26 = arith.constant dense<0.000000e+00> : vector<8x128xf32>
    %35 = tpu.matmul %33, %34, %cst_26 {dimension_numbers = #tpu.dot_dimension_numbers<[1], [0], [0], [1], [0, 0, 1, 1], [], []>} : vector<8x64xbf16>, vector<64x128xbf16>, vector<8x128xf32> -> vector<8x128xf32>
    %c0_27 = arith.constant 0 : index
    %c0_28 = arith.constant 0 : index
    %36 = vector.load %arg11[%c0_27, %c0_28] : memref<1x128xf32, #tpu.memory_space<vmem>>, vector<1x128xf32>
    %37 = vector.broadcast %36 : vector<1x128xf32> to vector<8x128xf32>
    %38 = arith.addf %35, %37 : vector<8x128xf32>
    %39 = arith.truncf %38 : vector<8x128xf32> to vector<8x128xbf16>
    %c0_29 = arith.constant 0 : index
    %c0_30 = arith.constant 0 : index
    %40 = vector.load %arg12[%c0_29, %c0_30] : memref<8x128xbf16, #tpu.memory_space<vmem>>, vector<8x128xbf16>
    tpu.vector_store %arg12[%c0_29, %c0_30], %39 {strides = array<i32>} : memref<8x128xbf16, #tpu.memory_space<vmem>>, vector<8x128xbf16>,
    return
  }
  func.func @transform_0(%arg0: i32) -> (i32, i32) {
    %c0_i32 = arith.constant 0 : i32
    %c0_i32_0 = arith.constant 0 : i32
    return %arg0, %c0_i32 : i32, i32
  }
  func.func @transform_1(%arg0: i32) -> (i32, i32) {
    %c0_i32 = arith.constant 0 : i32
    %c0_i32_0 = arith.constant 0 : i32
    %c0_i32_1 = arith.constant 0 : i32
    return %c0_i32, %c0_i32_0 : i32, i32
  }
  func.func @transform_2(%arg0: i32) -> (i32, i32) {
    %c0_i32 = arith.constant 0 : i32
    %c0_i32_0 = arith.constant 0 : i32
    %c0_i32_1 = arith.constant 0 : i32
    return %c0_i32, %c0_i32_0 : i32, i32
  }
  func.func @transform_3(%arg0: i32) -> (i32, i32) {
    %c0_i32 = arith.constant 0 : i32
    %c0_i32_0 = arith.constant 0 : i32
    %c0_i32_1 = arith.constant 0 : i32
    return %c0_i32, %c0_i32_0 : i32, i32
  }
  func.func @transform_4(%arg0: i32) -> (i32, i32) {
    %c0_i32 = arith.constant 0 : i32
    %c0_i32_0 = arith.constant 0 : i32
    %c0_i32_1 = arith.constant 0 : i32
    return %c0_i32, %c0_i32_0 : i32, i32
  }
  func.func @transform_5(%arg0: i32) -> (i32, i32) {
    %c0_i32 = arith.constant 0 : i32
    %c0_i32_0 = arith.constant 0 : i32
    %c0_i32_1 = arith.constant 0 : i32
    return %c0_i32, %c0_i32_0 : i32, i32
  }
  func.func @transform_6(%arg0: i32) -> (i32, i32) {
    %c0_i32 = arith.constant 0 : i32
    %c0_i32_0 = arith.constant 0 : i32
    %c0_i32_1 = arith.constant 0 : i32
    return %c0_i32, %c0_i32_0 : i32, i32
  }
  func.func @transform_7(%arg0: i32) -> (i32, i32) {
    %c0_i32 = arith.constant 0 : i32
    %c0_i32_0 = arith.constant 0 : i32
    %c0_i32_1 = arith.constant 0 : i32
    return %c0_i32, %c0_i32_0 : i32, i32
  }
  func.func @transform_8(%arg0: i32) -> (i32, i32) {
    %c0_i32 = arith.constant 0 : i32
    %c0_i32_0 = arith.constant 0 : i32
    %c0_i32_1 = arith.constant 0 : i32
    return %c0_i32, %c0_i32_0 : i32, i32
  }
  func.func @transform_9(%arg0: i32) -> (i32, i32) {
    %c0_i32 = arith.constant 0 : i32
    %c0_i32_0 = arith.constant 0 : i32
    %c0_i32_1 = arith.constant 0 : i32
    return %c0_i32, %c0_i32_0 : i32, i32
  }
  func.func @transform_10(%arg0: i32) -> (i32, i32) {
    %c0_i32 = arith.constant 0 : i32
    %c0_i32_0 = arith.constant 0 : i32
    %c0_i32_1 = arith.constant 0 : i32
    return %c0_i32, %c0_i32_0 : i32, i32
  }
  func.func @transform_11(%arg0: i32) -> (i32, i32) {
    %c0_i32 = arith.constant 0 : i32
    %c0_i32_0 = arith.constant 0 : i32
    return %arg0, %c0_i32 : i32, i32
  }
}

</mosaic_0001>

<bundles_post_ra>
// kernel: tpu_custom_call.1
= control target key start
LH: loop header
LB: loop body
LE: loop exit
PB: predicated region body
PF: predicated region fallthrough
CT: control target
= control target key end

     0   :  { %16 = vsyncpa [#allocation3], 0  ;;  %s4262_s0 = inlined_call_operand.vmem [shape: f32[8,784], index: 0, kind: input, shape index: {}]   ;;  %s4263_s1 = inlined_call_operand.hbm [shape: bf16[784,512], index: 1, kind: input, shape index: {}]   ;;  %s4264_s2 = inlined_call_operand.vmem [shape: f32[1,512], index: 2, kind: input, shape index: {}]   ;;  %s4265_s3 = inlined_call_operand.hbm [shape: bf16[512,256], index: 3, kind: input, shape index: {}]   ;;  %s4266_s4 = inlined_call_operand.vmem [shape: f32[1,256], index: 4, kind: input, shape index: {}]   ;;  %s4267_s5 = inlined_call_operand.hbm [shape: bf16[256,128], index: 5, kind: input, shape index: {}]   ;;  %s4268_s6 = inlined_call_operand.vmem [shape: f32[1,128], index: 6, kind: input, shape index: {}]   ;;  %s4269_s7 = inlined_call_operand.vmem [shape: bf16[128,64], index: 7, kind: input, shape index: {}]   ;;  %s4270_s8 = inlined_call_operand.vmem [shape: f32[1,64], index: 8, kind: input, shape index: {}]   ;;  %s4271_s9 = inlined_call_operand.vmem [shape: bf16[64,128], index: 9, kind: input, shape index: {}]   ;;  %s4272_s10 = inlined_call_operand.vmem [shape: f32[1,128], index: 10, kind: input, shape index: {}]   ;;  %s4273_s11 = inlined_call_operand.hbm [shape: bf16[8,128], index: 11, kind: output, shape index: {}]  }
   0x1   :  { %17 = vsyncpa [#allocation6], 0  ;;  %s40_s19 = sshll.u32 %s4265_s3, 4  ;;  %s41_s19 = int_to_ptr.hbm [resolvable:$true] %s40_s19 }
   0x2   :  { %18 = vsyncpa [#allocation4], 0  ;;  %s4037_s20 = smov [#allocation5]   ;;  %s25_s24 = sshll.u32 %s4263_s1, 4  ;;  %s26_s24 = int_to_ptr.hbm [resolvable:$true] %s25_s24 }
   0x3   :  { %s42_s21 = sshll.u32 %s4037_s20, 4  ;;  %s4038_s25 = smov 128   ;;  %s43_s21 = int_to_ptr.vmem [resolvable:$true] %s42_s21 }
   0x4   :  { %s4039_s26 = smov 8   ;;  %s4040_s27 = smov [#allocation2]  }
   0x5   :  { %48 = dma.hbm_to_vmem [thread:$0]  %s41_s19, 8192, %s43_s21, [#allocation6], %s4038_s25, %s4038_s25, %s4039_s26  }
   0x6   :  { %s27_s28 = sshll.u32 %s4040_s27, 4  ;;  %s4041_s29 = smov 256   ;;  %s28_s28 = int_to_ptr.vmem [resolvable:$true] %s27_s28 }
   0x7   :  { %s4042_s30 = smov 16   ;;  %s55_s13 = sshll.u32 %s4267_s5, 4  ;;  %s56_s13 = int_to_ptr.hbm [resolvable:$true] %s55_s13 }
   0x8   :  { %33 = dma.hbm_to_vmem [thread:$0]  %s26_s24, 25088, %s28_s28, [#allocation3], %s4041_s29, %s4041_s29, %s4042_s30  }
   0x9   :  { %s4043_s14 = smov [#allocation7]   ;;  %s4044_s16 = smov 64  }
   0xa   :  { %s57_s15 = sshll.u32 %s4043_s14, 4  ;;  %s4045_s1 = smov 4   ;;  %s58_s15 = int_to_ptr.vmem [resolvable:$true] %s57_s15 }
   0xb   :  { %63 = dma.hbm_to_vmem [thread:$0]  %s56_s13, 2048, %s58_s15, [#allocation6], %s4044_s16, %s4044_s16, %s4045_s1  }
   0xc   :  { %4031 = dma.done.wait [#allocation3], 25088  }
   0xd   :  { %4032 = vsyncadd [#allocation3], 4294942208 }
   0xe   :  { %4033 = dma.done.wait [#allocation6], 10240  }
   0xf   :  { %4034 = vsyncadd [#allocation6], 4294957056  ;;  %v2591_v0 = vld [vmem:[#allocation2 + $0xe0] sm:$0xf]  ;;  %v3664_v1 = vld [vmem:[#allocation2 + $0xec] sm:$0xf0] }
  0x10   :  { %v2719_v2 = vld [vmem:[#allocation2 + $0x1e0] sm:$0xf]  ;;  %v2592_v3 = vor.u32 %v3664_v1, %v2591_v0  ;;  %v3696_v4 = vld [vmem:[#allocation2 + $0x1ec] sm:$0xf0]  ;;  %vm1287_vm0 = vcmask 130048   ;;  %vm2440_vm1 = vcmask 523264  }
  0x11   :  { %v2847_v5 = vld [vmem:[#allocation2 + $0x2e0] sm:$0xf]  ;;  %v3728_v6 = vld [vmem:[#allocation2 + $0x2ec] sm:$0xf0]  ;;  %v2720_v7 = vor.u32 %v3696_v4, %v2719_v2  ;;  %s4046_s14 = smov [#allocation8]   ;;  %s2466_s1 = sshll.u32 %s4273_s11, 4  ;;  %s2467_s1 = int_to_ptr.hbm [resolvable:$true] %s2466_s1 }
  0x12   :  { %v2848_v8 = vor.u32 %v3728_v6, %v2847_v5  ;;  %v2975_v9 = vld [vmem:[#allocation2 + $0x3e0] sm:$0xf]  ;;  %v3760_v10 = vld [vmem:[#allocation2 + $0x3ec] sm:$0xf0]  ;;  %1291 = vmatpush.bf16.msra.mxu0 %v2592_v3  ;;  %s2464_s15 = sshll.u32 %s4046_s14, 4  ;;  %s2465_s15 = int_to_ptr.vmem [resolvable:$true] %s2464_s15 }
  0x13   :  { %v2575_v11 = vld [vmem:[#allocation2 + $0xc0] sm:$0xf]  ;;  %v2976_v12 = vor.u32 %v3760_v10, %v2975_v9  ;;  %v3660_v13 = vld [vmem:[#allocation2 + $0xcc] sm:$0xf0]  ;;  %1304 = vmatpush.bf16.msra.mxu1 %v2720_v7 }
  0x14   :  { %v2703_v14 = vld [vmem:[#allocation2 + $0x1c0] sm:$0xf]  ;;  %v3692_v15 = vld [vmem:[#allocation2 + $0x1cc] sm:$0xf0]  ;;  %1317 = vmatpush.bf16.msra.mxu2 %v2848_v8  ;;  %v2576_v16 = vor.u32 %v3660_v13, %v2575_v11 }
  0x15   :  { %v2704_v17 = vor.u32 %v3692_v15, %v2703_v14  ;;  %v2831_v18 = vld [vmem:[#allocation2 + $0x2c0] sm:$0xf]  ;;  %v3724_v19 = vld [vmem:[#allocation2 + $0x2cc] sm:$0xf0]  ;;  %1330 = vmatpush.bf16.msra.mxu3 %v2976_v12 }
  0x16   :  { %v2959_v20 = vld [vmem:[#allocation2 + $0x3c0] sm:$0xf]  ;;  %v2832_v21 = vor.u32 %v3724_v19, %v2831_v18  ;;  %v3756_v22 = vld [vmem:[#allocation2 + $0x3cc] sm:$0xf0]  ;;  %1292 = vmatpush.bf16.msra.mxu0 %v2576_v16 }
  0x17   :  { %v2559_v23 = vld [vmem:[#allocation2 + $0xa0] sm:$0xf]  ;;  %v3656_v24 = vld [vmem:[#allocation2 + $0xac] sm:$0xf0]  ;;  %v2960_v25 = vor.u32 %v3756_v22, %v2959_v20  ;;  %1305 = vmatpush.bf16.msra.mxu1 %v2704_v17 }
  0x18   :  { %v2687_v26 = vld [vmem:[#allocation2 + $0x1a0] sm:$0xf]  ;;  %v3688_v27 = vld [vmem:[#allocation2 + $0x1ac] sm:$0xf0]  ;;  %v2560_v29 = vor.u32 %v3656_v24, %v2559_v23  ;;  %1318 = vmatpush.bf16.msra.mxu2 %v2832_v21 }
  0x19   :  { %v2815_v28 = vld [vmem:[#allocation2 + $0x2a0] sm:$0xf]  ;;  %v3720_v30 = vld [vmem:[#allocation2 + $0x2ac] sm:$0xf0]  ;;  %v2688_v33 = vor.u32 %v3688_v27, %v2687_v26  ;;  %1331 = vmatpush.bf16.msra.mxu3 %v2960_v25 }
  0x1a   :  { %v2943_v31 = vld [vmem:[#allocation2 + $0x3a0] sm:$0xf]  ;;  %v3752_v32 = vld [vmem:[#allocation2 + $0x3ac] sm:$0xf0]  ;;  %v2816_v34 = vor.u32 %v3720_v30, %v2815_v28  ;;  %1293 = vmatpush.bf16.msra.mxu0 %v2560_v29 }
  0x1b   :  { %v2543_v35 = vld [vmem:[#allocation2 + $0x80] sm:$0xf]  ;;  %v3652_v36 = vld [vmem:[#allocation2 + $0x8c] sm:$0xf0]  ;;  %v2944_v38 = vor.u32 %v3752_v32, %v2943_v31  ;;  %1306 = vmatpush.bf16.msra.mxu1 %v2688_v33  ;;  %v3662_v33 = vld [vmem:[#allocation2 + $0xe4] sm:$0xf] }
  0x1c   :  { %v2671_v37 = vld [vmem:[#allocation2 + $0x180] sm:$0xf]  ;;  %v3684_v39 = vld [vmem:[#allocation2 + $0x18c] sm:$0xf0]  ;;  %v2544_v44 = vor.u32 %v3652_v36, %v2543_v35  ;;  %1319 = vmatpush.bf16.msra.mxu2 %v2816_v34  ;;  %v2593_v34 = vld [vmem:[#allocation2 + $0xf0] sm:$0xf0] }
  0x1d   :  { %v2799_v40 = vld [vmem:[#allocation2 + $0x280] sm:$0xf]  ;;  %v3716_v41 = vld [vmem:[#allocation2 + $0x28c] sm:$0xf0]  ;;  %v2672_v45 = vor.u32 %v3684_v39, %v2671_v37  ;;  %1332 = vmatpush.bf16.msra.mxu3 %v2944_v38 }
  0x1e   :  { %v2927_v42 = vld [vmem:[#allocation2 + $0x380] sm:$0xf]  ;;  %v3748_v43 = vld [vmem:[#allocation2 + $0x38c] sm:$0xf0]  ;;  %v2800_v46 = vor.u32 %v3716_v41, %v2799_v40  ;;  %1294 = vmatpush.bf16.msra.mxu0 %v2544_v44  ;;  %v2721_v44 = vld [vmem:[#allocation2 + $0x1f0] sm:$0xf0] }
  0x1f   :  { %v2527_v47 = vld [vmem:[#allocation2 + $0x60] sm:$0xf]  ;;  %v3648_v48 = vld [vmem:[#allocation2 + $0x6c] sm:$0xf0]  ;;  %v2928_v50 = vor.u32 %v3748_v43, %v2927_v42  ;;  %1307 = vmatpush.bf16.msra.mxu1 %v2672_v45  ;;  %v3694_v43 = vld [vmem:[#allocation2 + $0x1e4] sm:$0xf] }
  0x20   :  { %v2655_v49 = vld [vmem:[#allocation2 + $0x160] sm:$0xf]  ;;  %v3680_v51 = vld [vmem:[#allocation2 + $0x16c] sm:$0xf0]  ;;  %v2528_v56 = vor.u32 %v3648_v48, %v2527_v47  ;;  %1320 = vmatpush.bf16.msra.mxu2 %v2800_v46  ;;  %v90_v45 = vld [vmem:[%s4262_s0 + $0x18] sm:$0xff]  ;;  %v2596_v47 = vor.u32 %v3662_v33, %v2593_v34 }
  0x21   :  { %v2783_v52 = vld [vmem:[#allocation2 + $0x260] sm:$0xf]  ;;  %v3712_v53 = vld [vmem:[#allocation2 + $0x26c] sm:$0xf0]  ;;  %v2656_v57 = vor.u32 %v3680_v51, %v2655_v49  ;;  %1333 = vmatpush.bf16.msra.mxu3 %v2928_v50 }
  0x22   :  { %v2911_v54 = vld [vmem:[#allocation2 + $0x360] sm:$0xf]  ;;  %v3744_v55 = vld [vmem:[#allocation2 + $0x36c] sm:$0xf0]  ;;  %v2784_v58 = vor.u32 %v3712_v53, %v2783_v52  ;;  %1295 = vmatpush.bf16.msra.mxu0 %v2528_v56  ;;  %v3658_v53 = vld [vmem:[#allocation2 + $0xc4] sm:$0xf] }
  0x23   :  { %v2511_v59 = vld [vmem:[#allocation2 + $0x40] sm:$0xf]  ;;  %v3644_v60 = vld [vmem:[#allocation2 + $0x4c] sm:$0xf0]  ;;  %v2912_v62 = vor.u32 %v3744_v55, %v2911_v54  ;;  %1308 = vmatpush.bf16.msra.mxu1 %v2656_v57  ;;  %v2577_v54 = vld [vmem:[#allocation2 + $0xd0] sm:$0xf0]  ;;  %v4129_v57 = vpack.c.bf16 %v90_v45, %v90_v45 }
  0x24   :  { %v2639_v61 = vld [vmem:[#allocation2 + $0x140] sm:$0xf]  ;;  %v3676_v63 = vld [vmem:[#allocation2 + $0x14c] sm:$0xf0]  ;;  %v2512_v4 = vor.u32 %v3644_v60, %v2511_v59  ;;  %1321 = vmatpush.bf16.msra.mxu2 %v2784_v58  ;;  %v88_v58 = vld [vmem:[%s4262_s0 + $0x8] sm:$0xff]  ;;  %v2724_v59 = vor.u32 %v3694_v43, %v2721_v44 }
  0x25   :  { %v2767_v0 = vld [vmem:[#allocation2 + $0x240] sm:$0xf]  ;;  %v3708_v1 = vld [vmem:[#allocation2 + $0x24c] sm:$0xf0]  ;;  %v2640_v5 = vor.u32 %v3676_v63, %v2639_v61  ;;  %1334 = vmatpush.bf16.msra.mxu3 %v2912_v62  ;;  %v3690_v61 = vld [vmem:[#allocation2 + $0x1c4] sm:$0xf] }
  0x26   :  { %v2895_v2 = vld [vmem:[#allocation2 + $0x340] sm:$0xf]  ;;  %v3740_v3 = vld [vmem:[#allocation2 + $0x34c] sm:$0xf0]  ;;  %v2768_v6 = vor.u32 %v3708_v1, %v2767_v0  ;;  %1296 = vmatpush.bf16.msra.mxu0 %v2512_v4  ;;  %v2705_v62 = vld [vmem:[#allocation2 + $0x1d0] sm:$0xf0]  ;;  %v2580_v0 = vor.u32 %v3658_v53, %v2577_v54 }
  0x27   :  { %v2495_v7 = vld [vmem:[#allocation2 + $0x20] sm:$0xf]  ;;  %v3640_v8 = vld [vmem:[#allocation2 + $0x2c] sm:$0xf0]  ;;  %v2896_v10 = vor.u32 %v3740_v3, %v2895_v2  ;;  %1309 = vmatpush.bf16.msra.mxu1 %v2640_v5  ;;  %v3654_v5 = vld [vmem:[#allocation2 + $0xa4] sm:$0xf] }
  0x28   :  { %v2623_v9 = vld [vmem:[#allocation2 + $0x120] sm:$0xf]  ;;  %v3672_v11 = vld [vmem:[#allocation2 + $0x12c] sm:$0xf0]  ;;  %v2496_v16 = vor.u32 %v3640_v8, %v2495_v7  ;;  %1322 = vmatpush.bf16.msra.mxu2 %v2768_v6  ;;  %v2561_v6 = vld [vmem:[#allocation2 + $0xb0] sm:$0xf0]  ;;  %v4136_v7 = vpack.c.bf16 %v88_v58, %v88_v58  ;;  %v2708_v8 = vor.u32 %v3690_v61, %v2705_v62 }
  0x29   :  { %v2751_v12 = vld [vmem:[#allocation2 + $0x220] sm:$0xf]  ;;  %v3704_v13 = vld [vmem:[#allocation2 + $0x22c] sm:$0xf0]  ;;  %v2624_v20 = vor.u32 %v3672_v11, %v2623_v9  ;;  %1335 = vmatpush.bf16.msra.mxu3 %v2896_v10  ;;  %v3686_v10 = vld [vmem:[#allocation2 + $0x1a4] sm:$0xf] }
  0x2a   :  { %v2879_v14 = vld [vmem:[#allocation2 + $0x320] sm:$0xf]  ;;  %v3736_v15 = vld [vmem:[#allocation2 + $0x32c] sm:$0xf0]  ;;  %v2752_v21 = vor.u32 %v3704_v13, %v2751_v12  ;;  %1297 = vmatpush.bf16.msra.mxu0 %v2496_v16  ;;  %v2689_v11 = vld [vmem:[#allocation2 + $0x1b0] sm:$0xf0]  ;;  %v2564_v13 = vor.u32 %v3654_v5, %v2561_v6 }
  0x2b   :  { %v2479_v17 = vld [vmem:[#allocation2] sm:$0xf]  ;;  %v3636_v18 = vld [vmem:[#allocation2 + $0xc] sm:$0xf0]  ;;  %v2880_v25 = vor.u32 %v3736_v15, %v2879_v14  ;;  %1310 = vmatpush.bf16.msra.mxu1 %v2624_v20  ;;  %v2692_v20 = vor.u32 %v3686_v10, %v2689_v11  ;;  %v3642_v43 = vld [vmem:[#allocation2 + $0x44] sm:$0xf] }
  0x2c   :  { %v2607_v19 = vld [vmem:[#allocation2 + $0x100] sm:$0xf]  ;;  %v3668_v22 = vld [vmem:[#allocation2 + $0x10c] sm:$0xf0]  ;;  %v2480_v32 = vor.u32 %v3636_v18, %v2479_v17  ;;  %1323 = vmatpush.bf16.msra.mxu2 %v2752_v21  ;;  %v3650_v18 = vld [vmem:[#allocation2 + $0x84] sm:$0xf] }
  0x2d   :  { %v2735_v23 = vld [vmem:[#allocation2 + $0x200] sm:$0xf]  ;;  %v3700_v24 = vld [vmem:[#allocation2 + $0x20c] sm:$0xf0]  ;;  %v2608_v36 = vor.u32 %v3668_v22, %v2607_v19  ;;  %1336 = vmatpush.bf16.msra.mxu3 %v2880_v25  ;;  %v2545_v19 = vld [vmem:[#allocation2 + $0x90] sm:$0xf0] }
  0x2e   :  { %v2863_v26 = vld [vmem:[#allocation2 + $0x300] sm:$0xf]  ;;  %v3732_v27 = vld [vmem:[#allocation2 + $0x30c] sm:$0xf0]  ;;  %v2736_v37 = vor.u32 %v3700_v24, %v2735_v23  ;;  %1298 = vmatpush.bf16.msra.mxu0 %v2480_v32  ;;  %v3682_v22 = vld [vmem:[#allocation2 + $0x184] sm:$0xf]  ;;  %v2548_v25 = vor.u32 %v3650_v18, %v2545_v19 }
  0x2f   :  { %v3103_v28 = vld [vmem:[#allocation2 + $0x4e0] sm:$0xf]  ;;  %v3792_v29 = vld [vmem:[#allocation2 + $0x4ec] sm:$0xf0]  ;;  %v2864_v41 = vor.u32 %v3732_v27, %v2863_v26  ;;  %1311 = vmatpush.bf16.msra.mxu1 %v2608_v36  ;;  %v2673_v23 = vld [vmem:[#allocation2 + $0x190] sm:$0xf0] }
  0x30   :  { %v3231_v30 = vld [vmem:[#allocation2 + $0x5e0] sm:$0xf]  ;;  %v3824_v31 = vld [vmem:[#allocation2 + $0x5ec] sm:$0xf0]  ;;  %v3104_v42 = vor.u32 %v3792_v29, %v3103_v28  ;;  %1324 = vmatpush.bf16.msra.mxu2 %v2736_v37  ;;  %v2676_v33 = vor.u32 %v3682_v22, %v2673_v23  ;;  %v2657_v36 = vld [vmem:[#allocation2 + $0x170] sm:$0xf0] }
  0x31   :  { %v89_v35 = vld [vmem:[%s4262_s0 + $0x10] sm:$0xff]  ;;  %v3247_v38 = vld [vmem:[#allocation2 + $0x600] sm:$0xf]  ;;  %v3232_v46 = vor.u32 %v3824_v31, %v3231_v30  ;;  %1337 = vmatpush.bf16.msra.mxu3 %v2864_v41  ;;  %v3646_v30 = vld [vmem:[#allocation2 + $0x64] sm:$0xf] }
  0x32   :  { %v3828_v39 = vld [vmem:[#allocation2 + $0x60c] sm:$0xf0]  ;;  %v87_v40 = vld [vmem:[%s4262_s0] sm:$0xff]  ;;  %v4125_v51 = vpack.c.bf16 %v89_v35, %v89_v35  ;;  %1343 = vmatpush.bf16.msrb.mxu0 %v3104_v42  ;;  %1312 = vmatmul.bf16.vlgmr.msra.gmra.mxu1 %v4136_v7  ;;  %v2529_v31 = vld [vmem:[#allocation2 + $0x70] sm:$0xf0] }
  0x33   :  { %v3087_v48 = vld [vmem:[#allocation2 + $0x4c0] sm:$0xf]  ;;  %v3788_v49 = vld [vmem:[#allocation2 + $0x4cc] sm:$0xf0]  ;;  %v4127_v55 = vpack.c.bf16 %v87_v40, %v87_v40  ;;  %v3248_v56 = vor.u32 %v3828_v39, %v3247_v38  ;;  %1356 = vmatpush.bf16.msrb.mxu1 %v3232_v46  ;;  %v3678_v35 = vld [vmem:[#allocation2 + $0x164] sm:$0xf]  ;;  %v2532_v38 = vor.u32 %v3646_v30, %v2529_v31 }
  0x34   :  { %v3215_v50 = vld [vmem:[#allocation2 + $0x5c0] sm:$0xf]  ;;  %v3820_v52 = vld [vmem:[#allocation2 + $0x5cc] sm:$0xf0]  ;;  %v3088_v60 = vor.u32 %v3788_v49, %v3087_v48  ;;  %1325 = vmatmul.bf16.vlgmr.msra.gmra.mxu2 %v4125_v51  ;;  %1338 = vmatmul.bf16.vlgmr.msra.gmra.mxu3 %v4129_v57  ;;  %v2513_v44 = vld [vmem:[#allocation2 + $0x50] sm:$0xf0]  ;;  %v2660_v46 = vor.u32 %v3678_v35, %v2657_v36 }
  0x35   :  { %1382 = vmatpush.bf16.msrb.mxu3 %v2596_v47  ;;  %v3216_v63 = vor.u32 %v3820_v52, %v3215_v50  ;;  %v3071_v1 = vld [vmem:[#allocation2 + $0x4a0] sm:$0xf]  ;;  %v3784_v2 = vld [vmem:[#allocation2 + $0x4ac] sm:$0xf0]  ;;  %1299 = vmatmul.bf16.vlgmr.msra.gmra.mxu0 %v4127_v55  ;;  %v3674_v48 = vld [vmem:[#allocation2 + $0x144] sm:$0xf]  ;;  %v2516_v52 = vor.u32 %v3642_v43, %v2513_v44 }
  0x36   :  { %v3199_v3 = vld [vmem:[#allocation2 + $0x5a0] sm:$0xf]  ;;  %v3816_v4 = vld [vmem:[#allocation2 + $0x5ac] sm:$0xf0]  ;;  %1376 = vmatpush.bf16.msrb.mxu2 %v3248_v56  ;;  %1344 = vmatpush.bf16.msrb.mxu0 %v3088_v60  ;;  %v3072_v9 = vor.u32 %v3784_v2, %v3071_v1  ;;  %v2641_v49 = vld [vmem:[#allocation2 + $0x150] sm:$0xf0] }
  0x37   :  { %1357 = vmatpush.bf16.msrb.mxu1 %v3216_v63  ;;  %v3200_v12 = vor.u32 %v3816_v4, %v3199_v3  ;;  %v3055_v14 = vld [vmem:[#allocation2 + $0x480] sm:$0xf]  ;;  %v3780_v15 = vld [vmem:[#allocation2 + $0x48c] sm:$0xf0]  ;;  %v2497_v60 = vld [vmem:[#allocation2 + $0x30] sm:$0xf0]  ;;  %v2644_v61 = vor.u32 %v3674_v48, %v2641_v49 }
  0x38   :  { %v3183_v16 = vld [vmem:[#allocation2 + $0x580] sm:$0xf]  ;;  %v3812_v17 = vld [vmem:[#allocation2 + $0x58c] sm:$0xf0]  ;;  %v3056_v21 = vor.u32 %v3780_v15, %v3055_v14  ;;  %v3670_v63 = vld [vmem:[#allocation2 + $0x124] sm:$0xf] }
  0x39   :  { %1383 = vmatpush.bf16.msrb.mxu3 %v2580_v0  ;;  %v3184_v24 = vor.u32 %v3812_v17, %v3183_v16  ;;  %v3039_v26 = vld [vmem:[#allocation2 + $0x460] sm:$0xf]  ;;  %v3776_v27 = vld [vmem:[#allocation2 + $0x46c] sm:$0xf0]  ;;  %v2625_v0 = vld [vmem:[#allocation2 + $0x130] sm:$0xf0] }
  0x3a   :  { %1395 = vmatpush.bf16.msra.mxu2 %v2724_v59  ;;  %1345 = vmatpush.bf16.msrb.mxu0 %v3072_v9  ;;  %v3167_v28 = vld [vmem:[#allocation2 + $0x560] sm:$0xf]  ;;  %v3808_v29 = vld [vmem:[#allocation2 + $0x56c] sm:$0xf0]  ;;  %v3040_v34 = vor.u32 %v3776_v27, %v3039_v26  ;;  %v3638_v59 = vld [vmem:[#allocation2 + $0x24] sm:$0xf]  ;;  %v2628_v14 = vor.u32 %v3670_v63, %v2625_v0 }
  0x3b   :  { %1358 = vmatpush.bf16.msrb.mxu1 %v3200_v12  ;;  %v93_v32 = vld [vmem:[%s4262_s0 + $0x30] sm:$0xff]  ;;  %v3168_v37 = vor.u32 %v3808_v29, %v3167_v28  ;;  %v3023_v39 = vld [vmem:[#allocation2 + $0x440] sm:$0xf]  ;;  %v2500_v3 = vor.u32 %v3638_v59, %v2497_v60  ;;  %v3726_v10 = vld [vmem:[#allocation2 + $0x2e4] sm:$0xf] }
  0x3c   :  { %v3772_v40 = vld [vmem:[#allocation2 + $0x44c] sm:$0xf0]  ;;  %v3151_v41 = vld [vmem:[#allocation2 + $0x540] sm:$0xf]  ;;  %v4143_v45 = vpack.c.bf16 %v93_v32, %v93_v32  ;;  %v2481_v9 = vld [vmem:[#allocation2 + $0x10] sm:$0xf0] }
  0x3d   :  { %1384 = vmatpush.bf16.msrb.mxu3 %v2564_v13  ;;  %v3804_v42 = vld [vmem:[#allocation2 + $0x54c] sm:$0xf0]  ;;  %v3024_v47 = vor.u32 %v3772_v40, %v3023_v39  ;;  %v3007_v53 = vld [vmem:[#allocation2 + $0x420] sm:$0xf]  ;;  %v2849_v11 = vld [vmem:[#allocation2 + $0x2f0] sm:$0xf0] }
  0x3e   :  { %1396 = vmatpush.bf16.msra.mxu2 %v2708_v8  ;;  %1346 = vmatpush.bf16.msrb.mxu0 %v3056_v21  ;;  %v3152_v50 = vor.u32 %v3804_v42, %v3151_v41  ;;  %v3768_v54 = vld [vmem:[#allocation2 + $0x42c] sm:$0xf0]  ;;  %v3135_v56 = vld [vmem:[#allocation2 + $0x520] sm:$0xf]  ;;  %v3634_v8 = vld [vmem:[#allocation2 + $0x4] sm:$0xf] }
  0x3f   :  { %1359 = vmatpush.bf16.msrb.mxu1 %v3184_v24  ;;  %v3800_v58 = vld [vmem:[#allocation2 + $0x52c] sm:$0xf0]  ;;  %v3008_v62 = vor.u32 %v3768_v54, %v3007_v53  ;;  %v2991_v1 = vld [vmem:[#allocation2 + $0x400] sm:$0xf]  ;;  %v3758_v12 = vld [vmem:[#allocation2 + $0x3e4] sm:$0xf]  ;;  %v2852_v24 = vor.u32 %v3726_v10, %v2849_v11 }
  0x40   :  { %v3136_v2 = vor.u32 %v3800_v58, %v3135_v56  ;;  %v3764_v4 = vld [vmem:[#allocation2 + $0x40c] sm:$0xf0]  ;;  %v3119_v5 = vld [vmem:[#allocation2 + $0x500] sm:$0xf]  ;;  %v2977_v13 = vld [vmem:[#allocation2 + $0x3f0] sm:$0xf0] }
  0x41   :  { %1385 = vmatpush.bf16.msrb.mxu3 %v2548_v25  ;;  %v3796_v6 = vld [vmem:[#allocation2 + $0x50c] sm:$0xf0]  ;;  %v2992_v15 = vor.u32 %v3764_v4, %v2991_v1  ;;  %v3790_v16 = vld [vmem:[#allocation2 + $0x4e4] sm:$0xf]  ;;  %v3105_v17 = vld [vmem:[#allocation2 + $0x4f0] sm:$0xf0]  ;;  %v2980_v25 = vor.u32 %v3758_v12, %v2977_v13 }
  0x42   :  { %1397 = vmatpush.bf16.msra.mxu2 %v2692_v20  ;;  %1347 = vmatpush.bf16.msrb.mxu0 %v3040_v34  ;;  %v91_v18 = vld [vmem:[%s4262_s0 + $0x20] sm:$0xff]  ;;  %v3120_v19 = vor.u32 %v3796_v6, %v3119_v5  ;;  %v2484_v20 = vor.u32 %v3634_v8, %v2481_v9  ;;  %v2609_v22 = vld [vmem:[#allocation2 + $0x110] sm:$0xf0]  ;;  %v92_v23 = vld [vmem:[%s4262_s0 + $0x28] sm:$0xff]  ;;  %v3108_v29 = vor.u32 %v3790_v16, %v3105_v17 }
  0x43   :  { %1360 = vmatpush.bf16.msrb.mxu1 %v3168_v37  ;;  %v3666_v21 = vld [vmem:[#allocation2 + $0x104] sm:$0xf]  ;;  %v3233_v27 = vld [vmem:[#allocation2 + $0x5f0] sm:$0xf0]  ;;  %v4153_v30 = vpack.c.bf16 %v91_v18, %v91_v18  ;;  %v4155_v35 = vpack.c.bf16 %v92_v23, %v92_v23 }
  0x44   :  { %3261 = vmatmul.msk.bf16.vlgmr.msrb.gmra.mxu2 %vm1287_vm0, %v4143_v45  ;;  %v3822_v26 = vld [vmem:[#allocation2 + $0x5e4] sm:$0xf]  ;;  %v2833_v31 = vld [vmem:[#allocation2 + $0x2d0] sm:$0xf0]  ;;  %v2612_v34 = vor.u32 %v3666_v21, %v2609_v22 }
  0x45   :  { %1386 = vmatpush.bf16.msrb.mxu3 %v2532_v38  ;;  %v3722_v28 = vld [vmem:[#allocation2 + $0x2c4] sm:$0xf]  ;;  %v3089_v37 = vld [vmem:[#allocation2 + $0x4d0] sm:$0xf0]  ;;  %v3236_v38 = vor.u32 %v3822_v26, %v3233_v27 }
  0x46   :  { %1398 = vmatpush.bf16.msra.mxu2 %v2676_v33  ;;  %1348 = vmatpush.bf16.msrb.mxu0 %v3024_v47  ;;  %v3754_v32 = vld [vmem:[#allocation2 + $0x3c4] sm:$0xf]  ;;  %v2961_v33 = vld [vmem:[#allocation2 + $0x3d0] sm:$0xf0]  ;;  %v2836_v39 = vor.u32 %v3722_v28, %v2833_v31 }
  0x47   :  { %1361 = vmatpush.bf16.msrb.mxu1 %v3152_v50  ;;  %v3786_v36 = vld [vmem:[#allocation2 + $0x4c4] sm:$0xf]  ;;  %v2964_v40 = vor.u32 %v3754_v32, %v2961_v33  ;;  %v3217_v42 = vld [vmem:[#allocation2 + $0x5d0] sm:$0xf0] }
  0x48   :  { %v3818_v41 = vld [vmem:[#allocation2 + $0x5c4] sm:$0xf]  ;;  %v3092_v44 = vor.u32 %v3786_v36, %v3089_v37  ;;  %v2945_v48 = vld [vmem:[#allocation2 + $0x3b0] sm:$0xf0] }
  0x49   :  { %1387 = vmatpush.bf16.msrb.mxu3 %v2516_v52  ;;  %v3718_v43 = vld [vmem:[#allocation2 + $0x2a4] sm:$0xf]  ;;  %v3073_v50 = vld [vmem:[#allocation2 + $0x4b0] sm:$0xf0]  ;;  %v3220_v52 = vor.u32 %v3818_v41, %v3217_v42 }
  0x4a   :  { %1399 = vmatpush.bf16.msra.mxu2 %v2660_v46  ;;  %1349 = vmatpush.bf16.msrb.mxu0 %v3008_v62  ;;  %v2817_v46 = vld [vmem:[#allocation2 + $0x2b0] sm:$0xf0]  ;;  %v3750_v47 = vld [vmem:[#allocation2 + $0x3a4] sm:$0xf] }
  0x4b   :  { %1362 = vmatpush.bf16.msrb.mxu1 %v3136_v2  ;;  %v3782_v49 = vld [vmem:[#allocation2 + $0x4a4] sm:$0xf]  ;;  %v2820_v53 = vor.u32 %v3718_v43, %v2817_v46  ;;  %v2948_v54 = vor.u32 %v3750_v47, %v2945_v48  ;;  %v3201_v58 = vld [vmem:[#allocation2 + $0x5b0] sm:$0xf0] }
  0x4c   :  { %v3814_v56 = vld [vmem:[#allocation2 + $0x5a4] sm:$0xf]  ;;  %v3076_v60 = vor.u32 %v3782_v49, %v3073_v50  ;;  %v2929_v63 = vld [vmem:[#allocation2 + $0x390] sm:$0xf0] }
  0x4d   :  { %1388 = vmatpush.bf16.msrb.mxu3 %v2500_v3  ;;  %v3714_v59 = vld [vmem:[#allocation2 + $0x284] sm:$0xf]  ;;  %v3057_v1 = vld [vmem:[#allocation2 + $0x490] sm:$0xf0]  ;;  %v3204_v2 = vor.u32 %v3814_v56, %v3201_v58  ;;  %v2599_v56 = vld [vmem:[#allocation2 + $0xe8] sm:$0xf] }
  0x4e   :  { %1400 = vmatpush.bf16.msra.mxu2 %v2644_v61  ;;  %1350 = vmatpush.bf16.msrb.mxu0 %v2992_v15  ;;  %v2801_v61 = vld [vmem:[#allocation2 + $0x290] sm:$0xf0]  ;;  %v3746_v62 = vld [vmem:[#allocation2 + $0x384] sm:$0xf]  ;;  %v3665_v58 = vld [vmem:[#allocation2 + $0xf4] sm:$0xf0] }
  0x4f   :  { %1363 = vmatpush.bf16.msrb.mxu1 %v3120_v19  ;;  %v3778_v0 = vld [vmem:[#allocation2 + $0x484] sm:$0xf]  ;;  %v2804_v3 = vor.u32 %v3714_v59, %v2801_v61  ;;  %v2932_v4 = vor.u32 %v3746_v62, %v2929_v63  ;;  %v3185_v6 = vld [vmem:[#allocation2 + $0x590] sm:$0xf0]  ;;  %v2727_v59 = vld [vmem:[#allocation2 + $0x1e8] sm:$0xf] }
  0x50   :  { %v3810_v5 = vld [vmem:[#allocation2 + $0x584] sm:$0xf]  ;;  %v3060_v9 = vor.u32 %v3778_v0, %v3057_v1  ;;  %v2785_v10 = vld [vmem:[#allocation2 + $0x270] sm:$0xf0]  ;;  %v3697_v61 = vld [vmem:[#allocation2 + $0x1f4] sm:$0xf0] }
  0x51   :  { %1389 = vmatpush.bf16.msrb.mxu3 %v2484_v20  ;;  %1351 = vmatmul.bf16.vlgmr.msrb.gmra.mxu0 %v4153_v30  ;;  %v3710_v8 = vld [vmem:[#allocation2 + $0x264] sm:$0xf]  ;;  %v2913_v12 = vld [vmem:[#allocation2 + $0x370] sm:$0xf0]  ;;  %v3188_v15 = vor.u32 %v3810_v5, %v3185_v6  ;;  %v2600_v6 = vor.u32 %v3665_v58, %v2599_v56  ;;  %v3649_v56 = vld [vmem:[#allocation2 + $0x74] sm:$0xf0] }
  0x52   :  { %1401 = vmatpush.bf16.msra.mxu2 %v2628_v14  ;;  %1408 = vmatpush.bf16.msra.mxu0 %v2852_v24  ;;  %v3742_v11 = vld [vmem:[#allocation2 + $0x364] sm:$0xf]  ;;  %v3041_v14 = vld [vmem:[#allocation2 + $0x470] sm:$0xf0]  ;;  %v2788_v16 = vor.u32 %v3710_v8, %v2785_v10  ;;  %v3729_v8 = vld [vmem:[#allocation2 + $0x2f4] sm:$0xf0] }
  0x53   :  { %1421 = vmatpush.bf16.msra.mxu1 %v2980_v25  ;;  %v3774_v13 = vld [vmem:[#allocation2 + $0x464] sm:$0xf]  ;;  %v2916_v17 = vor.u32 %v3742_v11, %v2913_v12  ;;  %v3169_v19 = vld [vmem:[#allocation2 + $0x570] sm:$0xf0]  ;;  %v3761_v10 = vld [vmem:[#allocation2 + $0x3f4] sm:$0xf0]  ;;  %v2728_v11 = vor.u32 %v3697_v61, %v2727_v59 }
  0x54   :  { %1364 = vmatmul.bf16.vlgmr.msrb.gmra.mxu1 %v4155_v35  ;;  %1390 = vmatmul.bf16.vlgmr.msrb.gmra.mxu3 %v4127_v55  ;;  %v3806_v18 = vld [vmem:[#allocation2 + $0x564] sm:$0xf]  ;;  %v3044_v21 = vor.u32 %v3774_v13, %v3041_v14  ;;  %v2769_v22 = vld [vmem:[#allocation2 + $0x250] sm:$0xf0]  ;;  %v2583_v13 = vld [vmem:[#allocation2 + $0xc8] sm:$0xf] }
  0x55   :  { %1434 = vmatpush.bf16.msra.mxu3 %v3108_v29  ;;  %v3706_v20 = vld [vmem:[#allocation2 + $0x244] sm:$0xf]  ;;  %v2897_v24 = vld [vmem:[#allocation2 + $0x350] sm:$0xf0]  ;;  %v3172_v27 = vor.u32 %v3806_v18, %v3169_v19  ;;  %v3661_v14 = vld [vmem:[#allocation2 + $0xd4] sm:$0xf0] }
  0x56   :  { %1402 = vmatpush.bf16.msra.mxu2 %v2612_v34  ;;  %1409 = vmatpush.bf16.msra.mxu0 %v2836_v39  ;;  %v3738_v23 = vld [vmem:[#allocation2 + $0x344] sm:$0xf]  ;;  %v3025_v26 = vld [vmem:[#allocation2 + $0x450] sm:$0xf0]  ;;  %v2772_v28 = vor.u32 %v3706_v20, %v2769_v22  ;;  %v2839_v20 = vld [vmem:[#allocation2 + $0x2c8] sm:$0xf] }
  0x57   :  { %1422 = vmatpush.bf16.msra.mxu1 %v2964_v40  ;;  %v3770_v25 = vld [vmem:[#allocation2 + $0x444] sm:$0xf]  ;;  %v2900_v29 = vor.u32 %v3738_v23, %v2897_v24  ;;  %v3153_v32 = vld [vmem:[#allocation2 + $0x550] sm:$0xf0]  ;;  %v3725_v22 = vld [vmem:[#allocation2 + $0x2d4] sm:$0xf0] }
  0x58   :  { %v3802_v31 = vld [vmem:[#allocation2 + $0x544] sm:$0xf]  ;;  %v3028_v34 = vor.u32 %v3770_v25, %v3025_v26  ;;  %v2753_v36 = vld [vmem:[#allocation2 + $0x230] sm:$0xf0]  ;;  %v2967_v23 = vld [vmem:[#allocation2 + $0x3c8] sm:$0xf] }
  0x59   :  { %1435 = vmatpush.bf16.msra.mxu3 %v3092_v44  ;;  %1403 = vmatmul.bf16.vlgmr.msra.gmra.mxu2 %v4136_v7  ;;  %v3702_v33 = vld [vmem:[#allocation2 + $0x224] sm:$0xf]  ;;  %v3009_v40 = vld [vmem:[#allocation2 + $0x430] sm:$0xf0]  ;;  %v3156_v41 = vor.u32 %v3802_v31, %v3153_v32  ;;  %v3757_v24 = vld [vmem:[#allocation2 + $0x3d4] sm:$0xf0]  ;;  %v2840_v31 = vor.u32 %v3725_v22, %v2839_v20 }
  0x5a   :  { %1447 = vmatpush.bf16.msrb.mxu2 %v3236_v38  ;;  %1410 = vmatpush.bf16.msra.mxu0 %v2820_v53  ;;  %v3734_v37 = vld [vmem:[#allocation2 + $0x324] sm:$0xf]  ;;  %v2881_v38 = vld [vmem:[#allocation2 + $0x330] sm:$0xf0]  ;;  %v2756_v44 = vor.u32 %v3702_v33, %v2753_v36  ;;  %v2567_v26 = vld [vmem:[#allocation2 + $0xa8] sm:$0xf]  ;;  %v2968_v32 = vor.u32 %v3757_v24, %v2967_v23 }
  0x5b   :  { %1423 = vmatpush.bf16.msra.mxu1 %v2948_v54  ;;  %v3766_v39 = vld [vmem:[#allocation2 + $0x424] sm:$0xf]  ;;  %v3137_v43 = vld [vmem:[#allocation2 + $0x530] sm:$0xf0]  ;;  %v2884_v46 = vor.u32 %v3734_v37, %v2881_v38  ;;  %v2823_v33 = vld [vmem:[#allocation2 + $0x2a8] sm:$0xf] }
  0x5c   :  { %v3798_v42 = vld [vmem:[#allocation2 + $0x524] sm:$0xf]  ;;  %v2737_v48 = vld [vmem:[#allocation2 + $0x210] sm:$0xf0]  ;;  %v3012_v50 = vor.u32 %v3766_v39, %v3009_v40  ;;  %v2951_v37 = vld [vmem:[#allocation2 + $0x3a8] sm:$0xf] }
  0x5d   :  { %1436 = vmatpush.bf16.msra.mxu3 %v3076_v60  ;;  %v3698_v47 = vld [vmem:[#allocation2 + $0x204] sm:$0xf]  ;;  %v2993_v54 = vld [vmem:[#allocation2 + $0x410] sm:$0xf0]  ;;  %v3140_v60 = vor.u32 %v3798_v42, %v3137_v43  ;;  %v3753_v38 = vld [vmem:[#allocation2 + $0x3b4] sm:$0xf0] }
  0x5e   :  { %1448 = vmatpush.bf16.msrb.mxu2 %v3220_v52  ;;  %1411 = vmatpush.bf16.msra.mxu0 %v2804_v3  ;;  %v3730_v49 = vld [vmem:[#allocation2 + $0x304] sm:$0xf]  ;;  %v2865_v52 = vld [vmem:[#allocation2 + $0x310] sm:$0xf0]  ;;  %v2740_v0 = vor.u32 %v3698_v47, %v2737_v48  ;;  %v2551_v40 = vld [vmem:[#allocation2 + $0x88] sm:$0xf] }
  0x5f   :  { %1424 = vmatpush.bf16.msra.mxu1 %v2932_v4  ;;  %v3762_v53 = vld [vmem:[#allocation2 + $0x404] sm:$0xf]  ;;  %v3249_v63 = vld [vmem:[#allocation2 + $0x610] sm:$0xf0]  ;;  %v2868_v1 = vor.u32 %v3730_v49, %v2865_v52  ;;  %v2855_v4 = vld [vmem:[#allocation2 + $0x2e8] sm:$0xf] }
  0x60   :  { %v3826_v62 = vld [vmem:[#allocation2 + $0x604] sm:$0xf]  ;;  %v3121_v3 = vld [vmem:[#allocation2 + $0x510] sm:$0xf0]  ;;  %v2996_v5 = vor.u32 %v3762_v53, %v2993_v54  ;;  %v2856_v18 = vor.u32 %v3729_v8, %v2855_v4  ;;  %v2679_v42 = vld [vmem:[#allocation2 + $0x188] sm:$0xf] }
  0x61   :  { %1437 = vmatpush.bf16.msra.mxu3 %v3060_v9  ;;  %v2983_v9 = vld [vmem:[#allocation2 + $0x3e8] sm:$0xf]  ;;  %v3252_v12 = vor.u32 %v3826_v62, %v3249_v63  ;;  %v3685_v43 = vld [vmem:[#allocation2 + $0x194] sm:$0xf0] }
  0x62   :  { %1449 = vmatpush.bf16.msrb.mxu2 %v3204_v2  ;;  %1412 = vmatpush.bf16.msra.mxu0 %v2788_v16  ;;  %v3794_v2 = vld [vmem:[#allocation2 + $0x504] sm:$0xf]  ;;  %v2711_v16 = vld [vmem:[#allocation2 + $0x1c8] sm:$0xf]  ;;  %v2984_v19 = vor.u32 %v3761_v10, %v2983_v9  ;;  %v3717_v49 = vld [vmem:[#allocation2 + $0x294] sm:$0xf0]  ;;  %v2680_v53 = vor.u32 %v3685_v43, %v2679_v42 }
  0x63   :  { %1425 = vmatpush.bf16.msra.mxu1 %v2916_v17  ;;  %v3693_v17 = vld [vmem:[#allocation2 + $0x1d4] sm:$0xf0]  ;;  %v2807_v47 = vld [vmem:[#allocation2 + $0x288] sm:$0xf] }
  0x64   :  { %v2712_v25 = vor.u32 %v3693_v17, %v2711_v16  ;;  %v3749_v52 = vld [vmem:[#allocation2 + $0x394] sm:$0xf0]  ;;  %v2535_v54 = vld [vmem:[#allocation2 + $0x68] sm:$0xf] }
  0x65   :  { %1438 = vmatpush.bf16.msra.mxu3 %v3044_v21  ;;  %v2584_v21 = vor.u32 %v3661_v14, %v2583_v13  ;;  %v2663_v58 = vld [vmem:[#allocation2 + $0x168] sm:$0xf]  ;;  %v3681_v59 = vld [vmem:[#allocation2 + $0x174] sm:$0xf0]  ;;  %v2536_v63 = vor.u32 %v3649_v56, %v2535_v54 }
  0x66   :  { %1450 = vmatpush.bf16.msrb.mxu2 %v3188_v15  ;;  %1413 = vmatpush.bf16.msra.mxu0 %v2772_v28  ;;  %v3124_v15 = vor.u32 %v3794_v2, %v3121_v3  ;;  %v2695_v28 = vld [vmem:[#allocation2 + $0x1a8] sm:$0xf]  ;;  %v3745_v2 = vld [vmem:[#allocation2 + $0x374] sm:$0xf0]  ;;  %v2664_v3 = vor.u32 %v3681_v59, %v2663_v58 }
  0x67   :  { %1426 = vmatpush.bf16.msra.mxu1 %v2900_v29  ;;  %v3689_v29 = vld [vmem:[#allocation2 + $0x1b4] sm:$0xf0]  ;;  %v2791_v62 = vld [vmem:[#allocation2 + $0x268] sm:$0xf] }
  0x68   :  { %v2696_v39 = vor.u32 %v3689_v29, %v2695_v28  ;;  %v2519_v4 = vld [vmem:[#allocation2 + $0x48] sm:$0xf]  ;;  %v3677_v8 = vld [vmem:[#allocation2 + $0x154] sm:$0xf0] }
  0x69   :  { %1439 = vmatpush.bf16.msra.mxu3 %v3028_v34  ;;  %v3721_v34 = vld [vmem:[#allocation2 + $0x2b4] sm:$0xf0]  ;;  %v2903_v14 = vld [vmem:[#allocation2 + $0x348] sm:$0xf] }
  0x6a   :  { %1451 = vmatpush.bf16.msrb.mxu2 %v3172_v27  ;;  %1414 = vmatpush.bf16.msra.mxu0 %v2756_v44  ;;  %v3657_v27 = vld [vmem:[#allocation2 + $0xb4] sm:$0xf0]  ;;  %v2824_v44 = vor.u32 %v3721_v34, %v2823_v33  ;;  %v2503_v17 = vld [vmem:[#allocation2 + $0x28] sm:$0xf] }
  0x6b   :  { %1427 = vmatpush.bf16.msra.mxu1 %v2884_v46  ;;  %v2568_v36 = vor.u32 %v3657_v27, %v2567_v26  ;;  %v2952_v46 = vor.u32 %v3753_v38, %v2951_v37  ;;  %v3709_v13 = vld [vmem:[#allocation2 + $0x254] sm:$0xf0]  ;;  %v2759_v23 = vld [vmem:[#allocation2 + $0x228] sm:$0xf] }
  0x6c   :  { %v3673_v20 = vld [vmem:[#allocation2 + $0x134] sm:$0xf0]  ;;  %v2887_v26 = vld [vmem:[#allocation2 + $0x328] sm:$0xf] }
  0x6d   :  { %1440 = vmatpush.bf16.msra.mxu3 %v3012_v50  ;;  %v2935_v50 = vld [vmem:[#allocation2 + $0x388] sm:$0xf]  ;;  %v3705_v24 = vld [vmem:[#allocation2 + $0x234] sm:$0xf0] }
  0x6e   :  { %1452 = vmatpush.bf16.msrb.mxu2 %v3156_v41  ;;  %1415 = vmatpush.bf16.msra.mxu0 %v2740_v0  ;;  %v3653_v41 = vld [vmem:[#allocation2 + $0x94] sm:$0xf0]  ;;  %v2936_v61 = vor.u32 %v3749_v52, %v2935_v50  ;;  %v2487_v28 = vld [vmem:[#allocation2 + $0x8] sm:$0xf]  ;;  %v2760_v38 = vor.u32 %v3705_v24, %v2759_v23  ;;  %v2601_v50 = vld [vmem:[#allocation2 + $0xf8] sm:$0xf0] }
  0x6f   :  { %1428 = vmatpush.bf16.msra.mxu1 %v2868_v1  ;;  %v2552_v48 = vor.u32 %v3653_v41, %v2551_v40  ;;  %v3713_v0 = vld [vmem:[#allocation2 + $0x274] sm:$0xf0]  ;;  %v2919_v1 = vld [vmem:[#allocation2 + $0x368] sm:$0xf] }
  0x70   :  { %v2792_v9 = vor.u32 %v3713_v0, %v2791_v62  ;;  %v2920_v10 = vor.u32 %v3745_v2, %v2919_v1  ;;  %v3737_v27 = vld [vmem:[#allocation2 + $0x334] sm:$0xf0]  ;;  %v3111_v34 = vld [vmem:[#allocation2 + $0x4e8] sm:$0xf]  ;;  %v3695_v1 = vld [vmem:[#allocation2 + $0x1ec] sm:$0xf] }
  0x71   :  { %1441 = vmatpush.bf16.msra.mxu3 %v2996_v5  ;;  %1416 = vmatmul.bf16.vlgmr.msra.gmra.mxu0 %v4125_v51  ;;  %v3645_v5 = vld [vmem:[#allocation2 + $0x54] sm:$0xf0]  ;;  %v3239_v37 = vld [vmem:[#allocation2 + $0x5e8] sm:$0xf]  ;;  %v2729_v2 = vld [vmem:[#allocation2 + $0x1f8] sm:$0xf0] }
  0x72   :  { %1453 = vmatpush.bf16.msrb.mxu2 %v3140_v60  ;;  %1467 = vmatpush.bf16.msrb.mxu0 %v3252_v12  ;;  %v2808_v60 = vor.u32 %v3717_v49, %v2807_v47  ;;  %v2520_v12 = vor.u32 %v3645_v5, %v2519_v4  ;;  %v3669_v33 = vld [vmem:[#allocation2 + $0x114] sm:$0xf0]  ;;  %v2743_v41 = vld [vmem:[#allocation2 + $0x208] sm:$0xf]  ;;  %v3663_v47 = vld [vmem:[#allocation2 + $0xec] sm:$0xf] }
  0x73   :  { %1473 = vmatpush.bf16.msrb.mxu1 %v2600_v6  ;;  %v2647_v6 = vld [vmem:[#allocation2 + $0x148] sm:$0xf]  ;;  %v3825_v40 = vld [vmem:[#allocation2 + $0x5f4] sm:$0xf0]  ;;  %v3659_v4 = vld [vmem:[#allocation2 + $0xcc] sm:$0xf] }
  0x74   :  { %1442 = vmatmul.bf16.vlgmr.msra.gmra.mxu3 %v4153_v30  ;;  %1429 = vmatmul.bf16.vlgmr.msra.gmra.mxu1 %v4129_v57  ;;  %v2648_v16 = vor.u32 %v3677_v8, %v2647_v6  ;;  %v3701_v42 = vld [vmem:[#allocation2 + $0x214] sm:$0xf0]  ;;  %v3255_v52 = vld [vmem:[#allocation2 + $0x608] sm:$0xf]  ;;  %v3240_v54 = vor.u32 %v3825_v40, %v3239_v37  ;;  %v2585_v5 = vld [vmem:[#allocation2 + $0xd8] sm:$0xf0] }
  0x75   :  { %1486 = vmatpush.bf16.msrb.mxu3 %v2728_v11  ;;  %v2775_v11 = vld [vmem:[#allocation2 + $0x248] sm:$0xf]  ;;  %v3789_v58 = vld [vmem:[#allocation2 + $0x4d4] sm:$0xf0]  ;;  %v2744_v59 = vor.u32 %v3701_v42, %v2743_v41  ;;  %v3683_v40 = vld [vmem:[#allocation2 + $0x18c] sm:$0xf] }
  0x76   :  { %1454 = vmatpush.bf16.msrb.mxu2 %v3124_v15  ;;  %1499 = vmatpush.bf16.msra.mxu0 %v2856_v18  ;;  %v3741_v15 = vld [vmem:[#allocation2 + $0x354] sm:$0xf0]  ;;  %v3095_v56 = vld [vmem:[#allocation2 + $0x4c8] sm:$0xf]  ;;  %v2681_v41 = vld [vmem:[#allocation2 + $0x198] sm:$0xf0] }
  0x77   :  { %1474 = vmatpush.bf16.msrb.mxu1 %v2584_v21  ;;  %v3641_v18 = vld [vmem:[#allocation2 + $0x34] sm:$0xf0]  ;;  %v2776_v21 = vor.u32 %v3709_v13, %v2775_v11  ;;  %v2904_v22 = vor.u32 %v3741_v15, %v2903_v14  ;;  %v3079_v8 = vld [vmem:[#allocation2 + $0x4a8] sm:$0xf]  ;;  %v2588_v13 = vor.u32 %v3659_v4, %v2585_v5  ;;  %v3691_v14 = vld [vmem:[#allocation2 + $0x1cc] sm:$0xf] }
  0x78   :  { %v3821_v62 = vld [vmem:[#allocation2 + $0x5d4] sm:$0xf0]  ;;  %v3207_v11 = vld [vmem:[#allocation2 + $0x5a8] sm:$0xf]  ;;  %v2713_v15 = vld [vmem:[#allocation2 + $0x1d8] sm:$0xf0] }
  0x79   :  { %1487 = vmatpush.bf16.msrb.mxu3 %v2712_v25  ;;  %1455 = vmatmul.bf16.vlgmr.msrb.gmra.mxu2 %v4155_v35  ;;  %v2504_v25 = vor.u32 %v3641_v18, %v2503_v17  ;;  %v3655_v17 = vld [vmem:[#allocation2 + $0xac] sm:$0xf]  ;;  %v2569_v18 = vld [vmem:[#allocation2 + $0xb8] sm:$0xf0]  ;;  %v3191_v23 = vld [vmem:[#allocation2 + $0x588] sm:$0xf] }
  0x7a   :  { %1512 = vmatpush.bf16.msra.mxu2 %v2984_v19  ;;  %1500 = vmatpush.bf16.msra.mxu0 %v2840_v31  ;;  %v2631_v19 = vld [vmem:[#allocation2 + $0x128] sm:$0xf]  ;;  %v3637_v31 = vld [vmem:[#allocation2 + $0x14] sm:$0xf0]  ;;  %v3675_v4 = vld [vmem:[#allocation2 + $0x14c] sm:$0xf] }
  0x7b   :  { %1475 = vmatpush.bf16.msrb.mxu1 %v2568_v36  ;;  %v2632_v29 = vor.u32 %v3673_v20, %v2631_v19  ;;  %v3793_v36 = vld [vmem:[#allocation2 + $0x4f4] sm:$0xf0]  ;;  %v2488_v43 = vor.u32 %v3637_v31, %v2487_v28  ;;  %v3063_v20 = vld [vmem:[#allocation2 + $0x488] sm:$0xf]  ;;  %v2553_v31 = vld [vmem:[#allocation2 + $0x98] sm:$0xf0] }
  0x7c   :  { %v3112_v49 = vor.u32 %v3793_v36, %v3111_v34  ;;  %v3813_v24 = vld [vmem:[#allocation2 + $0x594] sm:$0xf0]  ;;  %v3175_v37 = vld [vmem:[#allocation2 + $0x568] sm:$0xf]  ;;  %v2649_v5 = vld [vmem:[#allocation2 + $0x158] sm:$0xf0] }
  0x7d   :  { %1488 = vmatpush.bf16.msrb.mxu3 %v2696_v39  ;;  %v2888_v39 = vor.u32 %v3737_v27, %v2887_v26  ;;  %v3687_v26 = vld [vmem:[#allocation2 + $0x1ac] sm:$0xf]  ;;  %v2697_v27 = vld [vmem:[#allocation2 + $0x1b8] sm:$0xf0]  ;;  %v3777_v34 = vld [vmem:[#allocation2 + $0x474] sm:$0xf0] }
  0x7e   :  { %1513 = vmatpush.bf16.msra.mxu2 %v2968_v32  ;;  %1501 = vmatpush.bf16.msra.mxu0 %v2824_v44  ;;  %v2615_v32 = vld [vmem:[#allocation2 + $0x108] sm:$0xf]  ;;  %v2700_v36 = vor.u32 %v3687_v26, %v2697_v27 }
  0x7f   :  { %1476 = vmatpush.bf16.msrb.mxu1 %v2552_v48  ;;  %v2871_v44 = vld [vmem:[#allocation2 + $0x308] sm:$0xf]  ;;  %v2616_v48 = vor.u32 %v3669_v33, %v2615_v32  ;;  %v3192_v32 = vor.u32 %v3813_v24, %v3191_v23  ;;  %v3635_v24 = vld [vmem:[#allocation2 + $0xc] sm:$0xf] }
  0x80   :  { %v3047_v33 = vld [vmem:[#allocation2 + $0x468] sm:$0xf] }
  0x81   :  { %1489 = vmatpush.bf16.msrb.mxu3 %v2680_v53  ;;  %3262 = vmatmul.msk.bf16.vlgmr.msrb.gmra.mxu0 %vm1287_vm0, %v4143_v45  ;;  %v3829_v53 = vld [vmem:[#allocation2 + $0x614] sm:$0xf0]  ;;  %v3048_v42 = vor.u32 %v3777_v34, %v3047_v33  ;;  %v3723_v33 = vld [vmem:[#allocation2 + $0x2cc] sm:$0xf]  ;;  %v2841_v34 = vld [vmem:[#allocation2 + $0x2d8] sm:$0xf0] }
  0x82   :  { %1514 = vmatpush.bf16.msra.mxu2 %v2952_v46  ;;  %1502 = vmatpush.bf16.msra.mxu0 %v2808_v60  ;;  %v3733_v46 = vld [vmem:[#allocation2 + $0x314] sm:$0xf0]  ;;  %v3256_v0 = vor.u32 %v3829_v53, %v3255_v52 }
  0x83   :  { %1477 = vmatpush.bf16.msrb.mxu1 %v2536_v63  ;;  %v2872_v60 = vor.u32 %v3733_v46, %v2871_v44  ;;  %v2604_v63 = vor.u32 %v3663_v47, %v2601_v50  ;;  %v2537_v44 = vld [vmem:[#allocation2 + $0x78] sm:$0xf0]  ;;  %v3031_v47 = vld [vmem:[#allocation2 + $0x448] sm:$0xf]  ;;  %v3805_v52 = vld [vmem:[#allocation2 + $0x554] sm:$0xf0] }
  0x84   :  { %v3159_v50 = vld [vmem:[#allocation2 + $0x548] sm:$0xf] }
  0x85   :  { %1490 = vmatpush.bf16.msrb.mxu3 %v2664_v3  ;;  %v3096_v3 = vor.u32 %v3789_v58, %v3095_v56  ;;  %v2665_v56 = vld [vmem:[#allocation2 + $0x178] sm:$0xf0] }
  0x86   :  { %1515 = vmatpush.bf16.msra.mxu2 %v2936_v61  ;;  %1503 = vmatpush.bf16.msra.mxu0 %v2792_v9  ;;  %v3223_v61 = vld [vmem:[#allocation2 + $0x5c8] sm:$0xf]  ;;  %v3785_v9 = vld [vmem:[#allocation2 + $0x4b4] sm:$0xf0] }
  0x87   :  { %1478 = vmatpush.bf16.msrb.mxu1 %v2520_v12  ;;  %v3224_v6 = vor.u32 %v3821_v62, %v3223_v61  ;;  %v3817_v12 = vld [vmem:[#allocation2 + $0x5b4] sm:$0xf0]  ;;  %v3160_v61 = vor.u32 %v3805_v52, %v3159_v50  ;;  %v3015_v62 = vld [vmem:[#allocation2 + $0x428] sm:$0xf]  ;;  %v3719_v50 = vld [vmem:[#allocation2 + $0x2ac] sm:$0xf] }
  0x88   :  { %v3208_v19 = vor.u32 %v3817_v12, %v3207_v11  ;;  %v3765_v12 = vld [vmem:[#allocation2 + $0x414] sm:$0xf0]  ;;  %v2825_v52 = vld [vmem:[#allocation2 + $0x2b8] sm:$0xf0] }
  0x89   :  { %1491 = vmatpush.bf16.msrb.mxu3 %v2648_v16  ;;  %v3080_v16 = vor.u32 %v3785_v9, %v3079_v8  ;;  %v3639_v8 = vld [vmem:[#allocation2 + $0x2c] sm:$0xf]  ;;  %v2505_v9 = vld [vmem:[#allocation2 + $0x38] sm:$0xf0] }
  0x8a   :  { %1516 = vmatpush.bf16.msra.mxu2 %v2920_v10  ;;  %1504 = vmatpush.bf16.msra.mxu0 %v2776_v21  ;;  %v2732_v10 = vor.u32 %v3695_v1, %v2729_v2  ;;  %v3781_v21 = vld [vmem:[#allocation2 + $0x494] sm:$0xf0]  ;;  %v3143_v1 = vld [vmem:[#allocation2 + $0x528] sm:$0xf] }
  0x8b   :  { %1479 = vmatpush.bf16.msrb.mxu1 %v2504_v25  ;;  %v2572_v25 = vor.u32 %v3655_v17, %v2569_v18  ;;  %v3064_v28 = vor.u32 %v3781_v21, %v3063_v20  ;;  %v3801_v2 = vld [vmem:[#allocation2 + $0x534] sm:$0xf0]  ;;  %v2857_v17 = vld [vmem:[#allocation2 + $0x2f8] sm:$0xf0]  ;;  %v3759_v18 = vld [vmem:[#allocation2 + $0x3ec] sm:$0xf] }
  0x8c   :  { %v3144_v11 = vor.u32 %v3801_v2, %v3143_v1  ;;  %v2985_v20 = vld [vmem:[#allocation2 + $0x3f8] sm:$0xf0]  ;;  %v3671_v21 = vld [vmem:[#allocation2 + $0x12c] sm:$0xf] }
  0x8d   :  { %1492 = vmatpush.bf16.msrb.mxu3 %v2632_v29  ;;  %v3651_v29 = vld [vmem:[#allocation2 + $0x8c] sm:$0xf]  ;;  %v2809_v2 = vld [vmem:[#allocation2 + $0x298] sm:$0xf0] }
  0x8e   :  { %1517 = vmatpush.bf16.msra.mxu2 %v2904_v22  ;;  %1505 = vmatpush.bf16.msra.mxu0 %v2760_v38  ;;  %v2716_v22 = vor.u32 %v3691_v14, %v2713_v15  ;;  %v3809_v38 = vld [vmem:[#allocation2 + $0x574] sm:$0xf0]  ;;  %v2652_v15 = vor.u32 %v3675_v4, %v2649_v5  ;;  %v3715_v1 = vld [vmem:[#allocation2 + $0x28c] sm:$0xf]  ;;  %v2937_v5 = vld [vmem:[#allocation2 + $0x398] sm:$0xf0] }
  0x8f   :  { %1480 = vmatpush.bf16.msrb.mxu1 %v2488_v43  ;;  %v3647_v43 = vld [vmem:[#allocation2 + $0x6c] sm:$0xf]  ;;  %v3176_v46 = vor.u32 %v3809_v38, %v3175_v37  ;;  %v3797_v14 = vld [vmem:[#allocation2 + $0x514] sm:$0xf0]  ;;  %v2969_v38 = vld [vmem:[#allocation2 + $0x3d8] sm:$0xf0] }
  0x90   :  { %v2540_v53 = vor.u32 %v3647_v43, %v2537_v44  ;;  %v3241_v43 = vld [vmem:[#allocation2 + $0x5f8] sm:$0xf0]  ;;  %v2844_v44 = vor.u32 %v3723_v33, %v2841_v34  ;;  %v3747_v4 = vld [vmem:[#allocation2 + $0x38c] sm:$0xf] }
  0x91   :  { %1493 = vmatpush.bf16.msrb.mxu3 %v2616_v48  ;;  %v3773_v48 = vld [vmem:[#allocation2 + $0x454] sm:$0xf0]  ;;  %v3807_v33 = vld [vmem:[#allocation2 + $0x56c] sm:$0xf]  ;;  %v3177_v34 = vld [vmem:[#allocation2 + $0x578] sm:$0xf0] }
  0x92   :  { %1518 = vmatpush.bf16.msra.mxu2 %v2888_v39  ;;  %1506 = vmatpush.bf16.msra.mxu0 %v2744_v59  ;;  %v2556_v39 = vor.u32 %v3651_v29, %v2553_v31  ;;  %v3032_v58 = vor.u32 %v3773_v48, %v3031_v47  ;;  %v3643_v59 = vld [vmem:[#allocation2 + $0x4c] sm:$0xf]  ;;  %v3113_v29 = vld [vmem:[#allocation2 + $0x4f8] sm:$0xf0]  ;;  %v2988_v31 = vor.u32 %v3759_v18, %v2985_v20 }
  0x93   :  { %1525 = vmatpush.bf16.msra.mxu1 %v3112_v49  ;;  %v2684_v49 = vor.u32 %v3683_v40, %v2681_v41  ;;  %v2617_v40 = vld [vmem:[#allocation2 + $0x118] sm:$0xf0]  ;;  %v3811_v20 = vld [vmem:[#allocation2 + $0x58c] sm:$0xf] }
  0x94   :  { %1494 = vmatmul.bf16.vlgmr.msrb.gmra.mxu3 %v4136_v7  ;;  %1481 = vmatmul.bf16.vlgmr.msrb.gmra.mxu1 %v4127_v55  ;;  %v3097_v47 = vld [vmem:[#allocation2 + $0x4d8] sm:$0xf0] }
  0x95   :  { %1538 = vmatpush.bf16.msra.mxu3 %v3240_v54  ;;  %1507 = vmatmul.bf16.vlgmr.msra.gmra.mxu0 %v4125_v51  ;;  %v3679_v54 = vld [vmem:[#allocation2 + $0x16c] sm:$0xf]  ;;  %v2921_v18 = vld [vmem:[#allocation2 + $0x378] sm:$0xf0] }
  0x96   :  { %1519 = vmatpush.bf16.msra.mxu2 %v2872_v60  ;;  %1558 = vmatpush.bf16.msrb.mxu0 %v3256_v0  ;;  %v2521_v60 = vld [vmem:[#allocation2 + $0x58] sm:$0xf0]  ;;  %v2668_v0 = vor.u32 %v3679_v54, %v2665_v56  ;;  %v3751_v54 = vld [vmem:[#allocation2 + $0x3ac] sm:$0xf] }
  0x97   :  { %1526 = vmatpush.bf16.msra.mxu1 %v3096_v3  ;;  %v2524_v3 = vor.u32 %v3643_v59, %v2521_v60  ;;  %v2953_v56 = vld [vmem:[#allocation2 + $0x3b8] sm:$0xf0]  ;;  %v3819_v59 = vld [vmem:[#allocation2 + $0x5cc] sm:$0xf] }
  0x98   :  { %v3225_v60 = vld [vmem:[#allocation2 + $0x5d8] sm:$0xf0] }
  0x99   :  { %1539 = vmatpush.bf16.msra.mxu3 %v3224_v6  ;;  %1520 = vmatmul.bf16.vlgmr.msra.gmra.mxu2 %v4129_v57 }
  0x9a   :  { %1564 = vmatpush.bf16.msrb.mxu2 %v2604_v63  ;;  %1577 = vmatpush.bf16.msra.mxu0 %v2732_v10  ;;  %v3769_v63 = vld [vmem:[#allocation2 + $0x434] sm:$0xf0]  ;;  %v2999_v10 = vld [vmem:[#allocation2 + $0x408] sm:$0xf] }
  0x9b   :  { %1527 = vmatpush.bf16.msra.mxu1 %v3080_v16  ;;  %v3016_v6 = vor.u32 %v3769_v63, %v3015_v62  ;;  %v3727_v16 = vld [vmem:[#allocation2 + $0x2ec] sm:$0xf]  ;;  %v3000_v23 = vor.u32 %v3765_v12, %v2999_v10  ;;  %v3081_v63 = vld [vmem:[#allocation2 + $0x4b8] sm:$0xf0]  ;;  %v2812_v10 = vor.u32 %v3715_v1, %v2809_v2  ;;  %v3323_v1 = vld [vmem:[#allocation5 + $0x70] sm:$0xf] }
  0x9c   :  { %v2860_v27 = vor.u32 %v3727_v16, %v2857_v17  ;;  %v3783_v62 = vld [vmem:[#allocation2 + $0x4ac] sm:$0xf]  ;;  %v3065_v12 = vld [vmem:[#allocation2 + $0x498] sm:$0xf0] }
  0x9d   :  { %1540 = vmatpush.bf16.msra.mxu3 %v3208_v19  ;;  %v2508_v19 = vor.u32 %v3639_v8, %v2505_v9  ;;  %v3815_v8 = vld [vmem:[#allocation2 + $0x5ac] sm:$0xf]  ;;  %v3209_v9 = vld [vmem:[#allocation2 + $0x5b8] sm:$0xf0] }
  0x9e   :  { %1565 = vmatpush.bf16.msrb.mxu2 %v2588_v13  ;;  %1578 = vmatpush.bf16.msra.mxu0 %v2716_v22  ;;  %v3127_v13 = vld [vmem:[#allocation2 + $0x508] sm:$0xf]  ;;  %v2633_v22 = vld [vmem:[#allocation2 + $0x138] sm:$0xf0]  ;;  %v3212_v16 = vor.u32 %v3815_v8, %v3209_v9  ;;  %v3743_v17 = vld [vmem:[#allocation2 + $0x36c] sm:$0xf] }
  0x9f   :  { %1528 = vmatpush.bf16.msra.mxu1 %v3064_v28  ;;  %v3128_v26 = vor.u32 %v3797_v14, %v3127_v13  ;;  %v3791_v28 = vld [vmem:[#allocation2 + $0x4ec] sm:$0xf]  ;;  %v2940_v13 = vor.u32 %v3747_v4, %v2937_v5  ;;  %v3145_v9 = vld [vmem:[#allocation2 + $0x538] sm:$0xf0] }
  0xa0   :  { %v3116_v41 = vor.u32 %v3791_v28, %v3113_v29  ;;  %v3711_v14 = vld [vmem:[#allocation2 + $0x26c] sm:$0xf] }
  0xa1   :  { %1541 = vmatpush.bf16.msra.mxu3 %v3192_v32  ;;  %v2636_v32 = vor.u32 %v3671_v21, %v2633_v22  ;;  %v3193_v21 = vld [vmem:[#allocation2 + $0x598] sm:$0xf0]  ;;  %v3739_v29 = vld [vmem:[#allocation2 + $0x34c] sm:$0xf] }
  0xa2   :  { %1566 = vmatpush.bf16.msrb.mxu2 %v2572_v25  ;;  %1579 = vmatpush.bf16.msra.mxu0 %v2700_v36  ;;  %v2489_v25 = vld [vmem:[#allocation2 + $0x18] sm:$0xf0]  ;;  %v3755_v36 = vld [vmem:[#allocation2 + $0x3cc] sm:$0xf] }
  0xa3   :  { %1529 = vmatpush.bf16.msra.mxu1 %v3048_v42  ;;  %v2492_v37 = vor.u32 %v3635_v24, %v2489_v25  ;;  %v3823_v42 = vld [vmem:[#allocation2 + $0x5ec] sm:$0xf]  ;;  %v2972_v48 = vor.u32 %v3755_v36, %v2969_v38  ;;  %v3049_v24 = vld [vmem:[#allocation2 + $0x478] sm:$0xf0] }
  0xa4   :  { %v3707_v25 = vld [vmem:[#allocation2 + $0x24c] sm:$0xf] }
  0xa5   :  { %1542 = vmatpush.bf16.msra.mxu3 %v3176_v46  ;;  %3263 = vmatmul.msk.bf16.vlgmr.msrb.gmra.mxu0 %vm1287_vm0, %v4143_v45  ;;  %v3787_v46 = vld [vmem:[#allocation2 + $0x4cc] sm:$0xf] }
  0xa6   :  { %1567 = vmatpush.bf16.msrb.mxu2 %v2556_v39  ;;  %1580 = vmatpush.bf16.msra.mxu0 %v2684_v49  ;;  %v3667_v39 = vld [vmem:[#allocation2 + $0x10c] sm:$0xf] }
  0xa7   :  { %1530 = vmatpush.bf16.msra.mxu1 %v3032_v58  ;;  %v2620_v49 = vor.u32 %v3667_v39, %v2617_v40  ;;  %v3100_v58 = vor.u32 %v3787_v46, %v3097_v47  ;;  %v3771_v38 = vld [vmem:[#allocation2 + $0x44c] sm:$0xf]  ;;  %v3033_v39 = vld [vmem:[#allocation2 + $0x458] sm:$0xf0] }
  0xa8   :  { %v3735_v46 = vld [vmem:[#allocation2 + $0x32c] sm:$0xf]  ;;  %v2889_v47 = vld [vmem:[#allocation2 + $0x338] sm:$0xf0] }
  0xa9   :  { %1543 = vmatpush.bf16.msra.mxu3 %v3160_v61  ;;  %v2828_v61 = vor.u32 %v3719_v50, %v2825_v52  ;;  %v3803_v50 = vld [vmem:[#allocation2 + $0x54c] sm:$0xf]  ;;  %v3161_v52 = vld [vmem:[#allocation2 + $0x558] sm:$0xf0] }
  0xaa   :  { %1568 = vmatpush.bf16.msrb.mxu2 %v2540_v53  ;;  %1581 = vmatpush.bf16.msra.mxu0 %v2668_v0  ;;  %v3244_v53 = vor.u32 %v3823_v42, %v3241_v43  ;;  %v2956_v0 = vor.u32 %v3751_v54, %v2953_v56  ;;  %v3703_v42 = vld [vmem:[#allocation2 + $0x22c] sm:$0xf]  ;;  %v2761_v43 = vld [vmem:[#allocation2 + $0x238] sm:$0xf0] }
  0xab   :  { %1531 = vmatpush.bf16.msra.mxu1 %v3016_v6  ;;  %v3084_v6 = vor.u32 %v3783_v62, %v3081_v63  ;;  %v2764_v54 = vor.u32 %v3703_v42, %v2761_v43  ;;  %v3767_v56 = vld [vmem:[#allocation2 + $0x42c] sm:$0xf]  ;;  %v2873_v63 = vld [vmem:[#allocation2 + $0x318] sm:$0xf0]  ;;  %v3857_v42 = vld [vmem:[#allocation5 + $0xd4] sm:$0xf0] }
  0xac   :  { %v3731_v62 = vld [vmem:[#allocation2 + $0x30c] sm:$0xf] }
  0xad   :  { %1544 = vmatpush.bf16.msra.mxu3 %v3144_v11  ;;  %v3779_v11 = vld [vmem:[#allocation2 + $0x48c] sm:$0xf] }
  0xae   :  { %1569 = vmatpush.bf16.msrb.mxu2 %v2524_v3  ;;  %1582 = vmatpush.bf16.msra.mxu0 %v2652_v15  ;;  %v3228_v3 = vor.u32 %v3819_v59, %v3225_v60  ;;  %v2793_v15 = vld [vmem:[#allocation2 + $0x278] sm:$0xf0]  ;;  %v3699_v59 = vld [vmem:[#allocation2 + $0x20c] sm:$0xf]  ;;  %v2892_v60 = vor.u32 %v3735_v46, %v2889_v47 }
  0xaf   :  { %1532 = vmatpush.bf16.msra.mxu1 %v3000_v23  ;;  %v2796_v22 = vor.u32 %v3711_v14, %v2793_v15  ;;  %v3775_v23 = vld [vmem:[#allocation2 + $0x46c] sm:$0xf]  ;;  %v4179_v28 = vpop.f32.mrf.mxu1  ;;  %v2876_v15 = vor.u32 %v3731_v62, %v2873_v63  ;;  %v3283_v62 = vld [vmem:[#allocation5 + $0x20] sm:$0xf]  ;;  %v3835_v63 = vld [vmem:[#allocation5 + $0x24] sm:$0xf0] }
  0xb0   :  { %v3827_v2 = vld [vmem:[#allocation2 + $0x60c] sm:$0xf] }
  0xb1   :  { %1545 = vmatpush.bf16.msra.mxu3 %v3128_v26  ;;  %v2777_v26 = vld [vmem:[#allocation2 + $0x258] sm:$0xf0]  ;;  %v3799_v8 = vld [vmem:[#allocation2 + $0x52c] sm:$0xf] }
  0xb2   :  { %1570 = vmatpush.bf16.msrb.mxu2 %v2508_v19  ;;  %1583 = vmatpush.bf16.msra.mxu0 %v2636_v32  ;;  %v4177_v19 = vpop.f32.mrf.mxu0  ;;  %v3052_v32 = vor.u32 %v3775_v23, %v3049_v24  ;;  %v3315_v23 = vld [vmem:[#allocation5 + $0x60] sm:$0xf]  ;;  %v3843_v24 = vld [vmem:[#allocation5 + $0x64] sm:$0xf0] }
  0xb3   :  { %1590 = vmatpush.bf16.msrb.mxu1 %v2860_v27  ;;  %v3196_v27 = vor.u32 %v3811_v20, %v3193_v21  ;;  %v3148_v21 = vor.u32 %v3799_v8, %v3145_v9 }
  0xb4   :  { %1533 = vmatmul.bf16.vlgmr.msra.gmra.mxu1 %v4153_v30  ;;  %1546 = vmatmul.bf16.vlgmr.msra.gmra.mxu3 %v4155_v35 }
  0xb5   :  { %1603 = vmatpush.bf16.msrb.mxu3 %v2988_v31  ;;  %v2905_v31 = vld [vmem:[#allocation2 + $0x358] sm:$0xf0] }
  0xb6   :  { %1571 = vmatpush.bf16.msrb.mxu2 %v2492_v37  ;;  %1584 = vmatpush.bf16.msra.mxu0 %v2620_v49  ;;  %v2780_v37 = vor.u32 %v3707_v25, %v2777_v26  ;;  %v2908_v40 = vor.u32 %v3739_v29, %v2905_v31  ;;  %v3036_v49 = vor.u32 %v3771_v38, %v3033_v39  ;;  %v3129_v25 = vld [vmem:[#allocation2 + $0x518] sm:$0xf0]  ;;  %v3379_v29 = vld [vmem:[#allocation5 + $0xe0] sm:$0xf]  ;;  %v3859_v31 = vld [vmem:[#allocation5 + $0xe4] sm:$0xf0] }
  0xb7   :  { %1591 = vmatpush.bf16.msrb.mxu1 %v2844_v44  ;;  %v4181_v36 = vpop.f32.mrf.mxu2  ;;  %v3180_v44 = vor.u32 %v3807_v33, %v3177_v34  ;;  %v1315_v4 = vpop.f32.mrf.mxu1  ;;  %v3307_v34 = vld [vmem:[#allocation5 + $0x50] sm:$0xf]  ;;  %v3380_v39 = vor.u32 %v3859_v31, %v3379_v29 }
  0xb8   :  { %v3275_v4 = vld [vmem:[#allocation5 + $0x10] sm:$0xf] }
  0xb9   :  { %1604 = vmatpush.bf16.msrb.mxu3 %v2972_v48  ;;  %1572 = vmatmul.bf16.vlgmr.msrb.gmra.mxu2 %v4127_v55  ;;  %v3068_v55 = vor.u32 %v3779_v11, %v3065_v12  ;;  %v3763_v12 = vld [vmem:[#allocation2 + $0x40c] sm:$0xf] }
  0xba   :  { %1616 = vmatpush.bf16.msra.mxu2 %v3116_v41  ;;  %1629 = vmatpush.bf16.msrb.mxu0 %v3244_v53  ;;  %v4183_v41 = vpop.f32.mrf.mxu3  ;;  %v1302_v48 = vpop.f32.mrf.mxu0  ;;  %v4188_v53 = vld [vmem:[%s4264_s2] sm:$0xf] }
  0xbb   :  { %1592 = vmatpush.bf16.msrb.mxu1 %v2828_v61  ;;  %1585 = vmatmul.bf16.vlgmr.msra.gmra.mxu0 %v4136_v7  ;;  %v2924_v7 = vor.u32 %v3743_v17, %v2921_v18  ;;  %v2745_v61 = vld [vmem:[#allocation2 + $0x218] sm:$0xf0]  ;;  %v299_v14 = vperm.slane %v4188_v53, 0  ;;  %v3387_v18 = vld [vmem:[#allocation5 + $0xf0] sm:$0xf] }
  0xbc   :  { %v2748_v11 = vor.u32 %v3699_v59, %v2745_v61  ;;  %v3363_v48 = vld [vmem:[#allocation5 + $0xc0] sm:$0xf]  ;;  %v3355_v59 = vld [vmem:[#allocation5 + $0xb0] sm:$0xf] }
  0xbd   :  { %1605 = vmatpush.bf16.msrb.mxu3 %v2956_v0  ;;  %v3164_v0 = vor.u32 %v3803_v50, %v3161_v52  ;;  %v3291_v50 = vld [vmem:[#allocation5 + $0x30] sm:$0xf]  ;;  %v3837_v52 = vld [vmem:[#allocation5 + $0x34] sm:$0xf0] }
  0xbe   :  { %1617 = vmatpush.bf16.msra.mxu2 %v3100_v58  ;;  %1630 = vmatpush.bf16.msrb.mxu0 %v3228_v3  ;;  %v3017_v58 = vld [vmem:[#allocation2 + $0x438] sm:$0xf0]  ;;  %v3292_v61 = vor.u32 %v3837_v52, %v3291_v50 }
  0xbf   :  { %1593 = vmatpush.bf16.msrb.mxu1 %v2812_v10  ;;  %v3257_v3 = vld [vmem:[#allocation2 + $0x618] sm:$0xf0]  ;;  %v3020_v5 = vor.u32 %v3767_v56, %v3017_v58  ;;  %v1328_v10 = vpop.f32.mrf.mxu2 }
  0xc1   :  { %1606 = vmatpush.bf16.msrb.mxu3 %v2940_v13  ;;  %v3001_v13 = vld [vmem:[#allocation2 + $0x418] sm:$0xf0] }
  0xc2   :  { %1618 = vmatpush.bf16.msra.mxu2 %v3084_v6  ;;  %1631 = vmatpush.bf16.msrb.mxu0 %v3212_v16  ;;  %v3845_v6 = vld [vmem:[#allocation5 + $0x74] sm:$0xf0]  ;;  %v3260_v16 = vor.u32 %v3827_v2, %v3257_v3  ;;  %v1341_v17 = vpop.f32.mrf.mxu3  ;;  %v3284_v2 = vor.u32 %v3835_v63, %v3283_v62 }
  0xc3   :  { %1594 = vmatpush.bf16.msrb.mxu1 %v2796_v22  ;;  %v3324_v20 = vor.u32 %v3845_v6, %v3323_v1  ;;  %v3004_v22 = vor.u32 %v3763_v12, %v3001_v13  ;;  %v3851_v1 = vld [vmem:[#allocation5 + $0xa4] sm:$0xf0]  ;;  %v3849_v12 = vld [vmem:[#allocation5 + $0x94] sm:$0xf0]  ;;  %v3844_v17 = vld [vmem:[#allocation5 + $0x74] sm:$0xf] }
  0xc5   :  { %1607 = vmatpush.bf16.msrb.mxu3 %v2924_v7  ;;  %v3795_v7 = vld [vmem:[#allocation2 + $0x50c] sm:$0xf] }
  0xc6   :  { %1619 = vmatpush.bf16.msra.mxu2 %v3068_v55  ;;  %1632 = vmatpush.bf16.msrb.mxu0 %v3196_v27  ;;  %v3861_v55 = vld [vmem:[#allocation5 + $0xf4] sm:$0xf0]  ;;  %v1301_v27 = vadd.f32 %v4177_v19, %v299_v14  ;;  %v3132_v33 = vor.u32 %v3795_v7, %v3129_v25 }
  0xc7   :  { %1595 = vmatpush.bf16.msrb.mxu1 %v2780_v37  ;;  %v3388_v26 = vor.u32 %v3861_v55, %v3387_v18  ;;  %v3841_v37 = vld [vmem:[#allocation5 + $0x54] sm:$0xf0]  ;;  %v1378_v38 = vpop.f32.mrf.mxu2  ;;  %v3325_v18 = vld [vmem:[#allocation5 + $0x78] sm:$0xf0] }
  0xc8   :  { %v1314_v19 = vadd.f32 %v4179_v28, %v1301_v27  ;;  %v3308_v43 = vor.u32 %v3841_v37, %v3307_v34  ;;  %v3328_v7 = vor.u32 %v3844_v17, %v3325_v18  ;;  %v3317_v27 = vld [vmem:[#allocation5 + $0x68] sm:$0xf0]  ;;  %v3858_v34 = vld [vmem:[#allocation5 + $0xe4] sm:$0xf]  ;;  %v3871_v17 = vld [vmem:[#allocation5 + $0x144] sm:$0xf0] }
  0xc9   :  { %1608 = vmatpush.bf16.msrb.mxu3 %v2908_v40  ;;  %v3371_v40 = vld [vmem:[#allocation5 + $0xd0] sm:$0xf]  ;;  %v3381_v37 = vld [vmem:[#allocation5 + $0xe8] sm:$0xf0] }
  0xca   :  { %1620 = vmatpush.bf16.msra.mxu2 %v3052_v32  ;;  %1633 = vmatpush.bf16.msrb.mxu0 %v3180_v44  ;;  %v3316_v32 = vor.u32 %v3843_v24, %v3315_v23  ;;  %v3299_v44 = vld [vmem:[#allocation5 + $0x40] sm:$0xf]  ;;  %v3372_v46 = vor.u32 %v3857_v42, %v3371_v40  ;;  %v1327_v47 = vadd.f32 %v4181_v36, %v1314_v19  ;;  %v3389_v23 = vld [vmem:[#allocation5 + $0xf8] sm:$0xf0]  ;;  %v3840_v19 = vld [vmem:[#allocation5 + $0x54] sm:$0xf] }
  0xcb   :  { %1596 = vmatpush.bf16.msrb.mxu1 %v2764_v54  ;;  %v3309_v40 = vld [vmem:[#allocation5 + $0x58] sm:$0xf0]  ;;  %v3384_v42 = vor.u32 %v3858_v34, %v3381_v37 }
  0xcc   :  { %v1340_v58 = vadd.f32 %v4183_v41, %v1327_v47  ;;  %v3877_v47 = vld [vmem:[#allocation5 + $0x174] sm:$0xf0] }
  0xcd   :  { %1609 = vmatpush.bf16.msrb.mxu3 %v2892_v60  ;;  %v3853_v60 = vld [vmem:[#allocation5 + $0xb4] sm:$0xf0] }
  0xce   :  { %1621 = vmatpush.bf16.msra.mxu2 %v3036_v49  ;;  %1634 = vmatpush.bf16.msrb.mxu0 %v3164_v0  ;;  %v1352_v28 = vpop.f32.mrf.mxu0  ;;  %v3347_v0 = vld [vmem:[#allocation5 + $0xa0] sm:$0xf] }
  0xcf   :  { %1597 = vmatpush.bf16.msrb.mxu1 %v2748_v11  ;;  %v1380_v56 = vpop.f32.mrf.mxu2  ;;  %v1353_v36 = vadd.f32 %v1352_v28, %v1340_v58  ;;  %v3348_v9 = vor.u32 %v3851_v1, %v3347_v0  ;;  %v3339_v11 = vld [vmem:[#allocation5 + $0x90] sm:$0xf]  ;;  %v3301_v28 = vld [vmem:[#allocation5 + $0x48] sm:$0xf0]  ;;  %v3836_v58 = vld [vmem:[#allocation5 + $0x34] sm:$0xf] }
  0xd0   :  { %v3340_v55 = vor.u32 %v3849_v12, %v3339_v11  ;;  %v3365_v56 = vld [vmem:[#allocation5 + $0xc8] sm:$0xf0]  ;;  %v3852_v0 = vld [vmem:[#allocation5 + $0xb4] sm:$0xf]  ;;  %v3357_v1 = vld [vmem:[#allocation5 + $0xb8] sm:$0xf0] }
  0xd1   :  { %1610 = vmatpush.bf16.msrb.mxu3 %v2876_v15  ;;  %v1365_v54 = vpop.f32.mrf.mxu1  ;;  %v3267_v15 = vld [vmem:[#allocation5] sm:$0xf]  ;;  %v3850_v11 = vld [vmem:[#allocation5 + $0xa4] sm:$0xf]  ;;  %v3349_v12 = vld [vmem:[#allocation5 + $0xa8] sm:$0xf0] }
  0xd2   :  { %1622 = vmatpush.bf16.msra.mxu2 %v3020_v5  ;;  %1635 = vmatpush.bf16.msrb.mxu0 %v3148_v21  ;;  %v1366_v3 = vadd.f32 %v1365_v54, %v1353_v36  ;;  %v3833_v5 = vld [vmem:[#allocation5 + $0x14] sm:$0xf0]  ;;  %v3854_v54 = vld [vmem:[#allocation5 + $0xc4] sm:$0xf] }
  0xd3   :  { %1649 = vmatpush.bf16.msra.mxu1 %v3260_v16  ;;  %v3276_v13 = vor.u32 %v3833_v5, %v3275_v4  ;;  %v3831_v16 = vld [vmem:[#allocation5 + $0x4] sm:$0xf0]  ;;  %v3368_v62 = vor.u32 %v3854_v54, %v3365_v56  ;;  %v3873_v4 = vld [vmem:[#allocation5 + $0x154] sm:$0xf0]  ;;  %v3834_v5 = vld [vmem:[#allocation5 + $0x24] sm:$0xf] }
  0xd4   :  { %1598 = vmatmul.bf16.vlgmr.msrb.gmra.mxu1 %v4125_v51  ;;  %1611 = vmatmul.bf16.vlgmr.msrb.gmra.mxu3 %v4129_v57  ;;  %v3839_v51 = vld [vmem:[#allocation5 + $0x44] sm:$0xf0]  ;;  %v1379_v14 = vadd.f32 %v1378_v38, %v1366_v3  ;;  %v3268_v21 = vor.u32 %v3831_v16, %v3267_v15  ;;  %v3435_v3 = vld [vmem:[#allocation5 + $0x150] sm:$0xf]  ;;  %v3277_v15 = vld [vmem:[#allocation5 + $0x18] sm:$0xf0] }
  0xd5   :  { %2053 = vmatpush.bf16.msra.mxu3 %v3324_v20  ;;  %v3855_v57 = vld [vmem:[#allocation5 + $0xc4] sm:$0xf0]  ;;  %v3300_v49 = vor.u32 %v3839_v51, %v3299_v44  ;;  %v3856_v51 = vld [vmem:[#allocation5 + $0xd4] sm:$0xf]  ;;  %v3427_v16 = vld [vmem:[#allocation5 + $0x140] sm:$0xf] }
  0xd6   :  { %1623 = vmatpush.bf16.msra.mxu2 %v3004_v22  ;;  %1636 = vmatpush.bf16.msrb.mxu0 %v3132_v33  ;;  %v1354_v41 = vpop.f32.mrf.mxu0  ;;  %v3847_v20 = vld [vmem:[#allocation5 + $0x84] sm:$0xf0]  ;;  %v3860_v22 = vld [vmem:[#allocation5 + $0xf4] sm:$0xf]  ;;  %v1655_v24 = vmax.f32 %v1379_v14, 0.0  ;;  %v300_v33 = vperm.slane %v4188_v53, 1 }
  0xd7   :  { %2066 = vmatpush.bf16.msrb.mxu1 %v3388_v26  ;;  %v1391_v6 = vpop.f32.mrf.mxu3  ;;  %v3842_v26 = vld [vmem:[#allocation5 + $0x64] sm:$0xf]  ;;  %v3285_v41 = vld [vmem:[#allocation5 + $0x28] sm:$0xf0]  ;;  %v3832_v14 = vld [vmem:[#allocation5 + $0x14] sm:$0xf] }
  0xd8   :  { %v4202_v38 = vpack.c.bf16 %v1655_v24, %v1655_v24  ;;  %v1392_v44 = vadd.f32 %v1391_v6, %v300_v33  ;;  %v3436_v6 = vor.u32 %v3873_v4, %v3435_v3  ;;  %v3341_v24 = vld [vmem:[#allocation5 + $0x98] sm:$0xf0]  ;;  %v3867_v33 = vld [vmem:[#allocation5 + $0x124] sm:$0xf0] }
  0xd9   :  { %2054 = vmatpush.bf16.msra.mxu3 %v3316_v32  ;;  %1624 = vmatmul.bf16.vlgmr.msra.gmra.mxu2 %v4153_v30  ;;  %v3364_v30 = vor.u32 %v3855_v57, %v3363_v48  ;;  %v1367_v8 = vpop.f32.mrf.mxu1  ;;  %v3392_v32 = vor.u32 %v3860_v22, %v3389_v23  ;;  %v3312_v48 = vor.u32 %v3840_v19, %v3309_v40  ;;  %v3848_v23 = vld [vmem:[#allocation5 + $0x94] sm:$0xf]  ;;  %v3846_v19 = vld [vmem:[#allocation5 + $0x84] sm:$0xf]  ;;  %v3333_v40 = vld [vmem:[#allocation5 + $0x88] sm:$0xf0] }
  0xda   :  { %1637 = vmatmul.bf16.vlgmr.msrb.gmra.mxu0 %v4155_v35  ;;  %v3356_v35 = vor.u32 %v3853_v60, %v3355_v59  ;;  %v3293_v59 = vld [vmem:[#allocation5 + $0x38] sm:$0xf0]  ;;  %v3443_v60 = vld [vmem:[#allocation5 + $0x160] sm:$0xf]  ;;  %v3344_v37 = vor.u32 %v3848_v23, %v3341_v24  ;;  %v3863_v54 = vld [vmem:[#allocation5 + $0x104] sm:$0xf0] }
  0xdb   :  { %2067 = vmatpush.bf16.msrb.mxu1 %v3380_v39  ;;  %v3320_v39 = vor.u32 %v3842_v26, %v3317_v27  ;;  %v3419_v26 = vld [vmem:[#allocation5 + $0x130] sm:$0xf]  ;;  %v3869_v27 = vld [vmem:[#allocation5 + $0x134] sm:$0xf0]  ;;  %v3437_v4 = vld [vmem:[#allocation5 + $0x158] sm:$0xf0] }
  0xdc   :  { %v1404_v10 = vpop.f32.mrf.mxu2  ;;  %v3866_v24 = vld [vmem:[#allocation5 + $0x124] sm:$0xf] }
  0xdd   :  { %2055 = vmatpush.bf16.msra.mxu3 %v3308_v43  ;;  %v3451_v43 = vld [vmem:[#allocation5 + $0x170] sm:$0xf]  ;;  %v1405_v52 = vadd.f32 %v1404_v10, %v1392_v44 }
  0xde   :  { %v3452_v57 = vor.u32 %v3877_v47, %v3451_v43  ;;  %v3403_v44 = vld [vmem:[#allocation5 + $0x110] sm:$0xf] }
  0xdf   :  { %2068 = vmatpush.bf16.msrb.mxu1 %v3372_v46  ;;  %v1393_v25 = vpop.f32.mrf.mxu3  ;;  %v3373_v46 = vld [vmem:[#allocation5 + $0xd8] sm:$0xf0] }
  0xe0   :  { %v3376_v50 = vor.u32 %v3856_v51, %v3373_v46  ;;  %2079 = vmatpush.bf16.msrb.mxu2 %v3452_v57  ;;  %v3830_v25 = vld [vmem:[#allocation5 + $0x4] sm:$0xf]  ;;  %v3865_v51 = vld [vmem:[#allocation5 + $0x114] sm:$0xf0] }
  0xe1   :  { %2056 = vmatpush.bf16.msra.mxu3 %v3300_v49  ;;  %v3838_v49 = vld [vmem:[#allocation5 + $0x44] sm:$0xf] }
  0xe3   :  { %2069 = vmatpush.bf16.msrb.mxu1 %v3364_v30  ;;  %v3304_v30 = vor.u32 %v3838_v49, %v3301_v28  ;;  %v3404_v28 = vor.u32 %v3865_v51, %v3403_v44  ;;  %v3397_v44 = vld [vmem:[#allocation5 + $0x108] sm:$0xf0] }
  0xe4   :  { %3264 = vmatmul.msk.bf16.vlgmr.msra.gmra.mxu1 %vm1287_vm0, %v4143_v45  ;;  %v3331_v45 = vld [vmem:[#allocation5 + $0x80] sm:$0xf]  ;;  %v1406_v31 = vpop.f32.mrf.mxu2 }
  0xe5   :  { %2057 = vmatpush.bf16.msra.mxu3 %v3292_v61  ;;  %v3332_v29 = vor.u32 %v3847_v20, %v3331_v45  ;;  %v3875_v61 = vld [vmem:[#allocation5 + $0x164] sm:$0xf0]  ;;  %v3352_v45 = vor.u32 %v3850_v11, %v3349_v12  ;;  %v3428_v20 = vor.u32 %v3871_v17, %v3427_v16  ;;  %v3420_v31 = vor.u32 %v3869_v27, %v3419_v26  ;;  %v3429_v11 = vld [vmem:[#allocation5 + $0x148] sm:$0xf0]  ;;  %v3868_v16 = vld [vmem:[#allocation5 + $0x134] sm:$0xf] }
  0xe6   :  { %v3444_v63 = vor.u32 %v3875_v61, %v3443_v60  ;;  %v3453_v60 = vld [vmem:[#allocation5 + $0x178] sm:$0xf0]  ;;  %v3483_v26 = vld [vmem:[#allocation5 + $0x1b0] sm:$0xf]  ;;  %v3885_v27 = vld [vmem:[#allocation5 + $0x1b4] sm:$0xf0] }
  0xe7   :  { %2070 = vmatpush.bf16.msrb.mxu1 %v3356_v35 }
  0xe8   :  { %2080 = vmatpush.bf16.msrb.mxu2 %v3444_v63 }
  0xe9   :  { %2058 = vmatpush.bf16.msra.mxu3 %v3284_v2  ;;  %v3296_v2 = vor.u32 %v3836_v58, %v3293_v59  ;;  %v3876_v59 = vld [vmem:[#allocation5 + $0x174] sm:$0xf] }
  0xea   :  { %v3456_v61 = vor.u32 %v3876_v59, %v3453_v60  ;;  %v3892_v59 = vld [vmem:[#allocation5 + $0x1f4] sm:$0xf]  ;;  %v3517_v60 = vld [vmem:[#allocation5 + $0x1f8] sm:$0xf0] }
  0xeb   :  { %2071 = vmatpush.bf16.msrb.mxu1 %v3348_v9  ;;  %v3360_v9 = vor.u32 %v3852_v0, %v3357_v1  ;;  %v3515_v0 = vld [vmem:[#allocation5 + $0x1f0] sm:$0xf]  ;;  %v3893_v1 = vld [vmem:[#allocation5 + $0x1f4] sm:$0xf0] }
  0xec   :  { %2081 = vmatpush.bf16.msrb.mxu2 %v3436_v6  ;;  %v3891_v6 = vld [vmem:[#allocation5 + $0x1e4] sm:$0xf0] }
  0xed   :  { %2059 = vmatpush.bf16.msra.mxu3 %v3276_v13  ;;  %v3288_v13 = vor.u32 %v3834_v5, %v3285_v41  ;;  %v3507_v41 = vld [vmem:[#allocation5 + $0x1e0] sm:$0xf] }
  0xee   :  { %v1417_v36 = vpop.f32.mrf.mxu0 }
  0xef   :  { %2072 = vmatpush.bf16.msrb.mxu1 %v3340_v55  ;;  %v1418_v35 = vadd.f32 %v1417_v36, %v1405_v52  ;;  %v3395_v52 = vld [vmem:[#allocation5 + $0x100] sm:$0xf]  ;;  %v3874_v36 = vld [vmem:[#allocation5 + $0x164] sm:$0xf] }
  0xf0   :  { %2082 = vmatpush.bf16.msrb.mxu2 %v3428_v20 }
  0xf1   :  { %2060 = vmatpush.bf16.msra.mxu3 %v3268_v21  ;;  %v1430_v8 = vpop.f32.mrf.mxu1 }
  0xf2   :  { %v1431_v10 = vadd.f32 %v1430_v8, %v1418_v35  ;;  %v3870_v8 = vld [vmem:[#allocation5 + $0x144] sm:$0xf] }
  0xf3   :  { %2073 = vmatpush.bf16.msrb.mxu1 %v3332_v29  ;;  %v3269_v29 = vld [vmem:[#allocation5 + $0x8] sm:$0xf0]  ;;  %v3432_v12 = vor.u32 %v3870_v8, %v3429_v11 }
  0xf4   :  { %2061 = vmatmul.bf16.vlgmr.msra.gmra.mxu3 %v4202_v38  ;;  %2083 = vmatpush.bf16.msrb.mxu2 %v3420_v31  ;;  %v3864_v31 = vld [vmem:[#allocation5 + $0x114] sm:$0xf] }
  0xf5   :  { %2105 = vmatpush.bf16.msrb.mxu3 %v3328_v7  ;;  %v3280_v7 = vor.u32 %v3832_v14, %v3277_v15  ;;  %v3499_v14 = vld [vmem:[#allocation5 + $0x1d0] sm:$0xf]  ;;  %v3889_v15 = vld [vmem:[#allocation5 + $0x1d4] sm:$0xf0] }
  0xf6   :  { %v1419_v18 = vpop.f32.mrf.mxu0 }
  0xf7   :  { %2118 = vmatpush.bf16.msra.mxu1 %v3392_v32  ;;  %v1443_v55 = vpop.f32.mrf.mxu3  ;;  %v3411_v32 = vld [vmem:[#allocation5 + $0x120] sm:$0xf] }
  0xf8   :  { %v1444_v21 = vadd.f32 %v1443_v55, %v1431_v10  ;;  %v3412_v43 = vor.u32 %v3867_v33, %v3411_v32  ;;  %v3508_v10 = vor.u32 %v3891_v6, %v3507_v41  ;;  %v3500_v55 = vor.u32 %v3889_v15, %v3499_v14  ;;  %v3405_v32 = vld [vmem:[#allocation5 + $0x118] sm:$0xf0]  ;;  %v3888_v41 = vld [vmem:[#allocation5 + $0x1d4] sm:$0xf]  ;;  %v3493_v14 = vld [vmem:[#allocation5 + $0x1c8] sm:$0xf0] }
  0xf9   :  { %2106 = vmatpush.bf16.msrb.mxu3 %v3320_v39  ;;  %v1432_v34 = vpop.f32.mrf.mxu1  ;;  %v301_v33 = vperm.slane %v4188_v53, 2  ;;  %v3501_v6 = vld [vmem:[#allocation5 + $0x1d8] sm:$0xf0] }
  0xfa   :  { %2084 = vmatpush.bf16.msrb.mxu2 %v3412_v43  ;;  %v3484_v34 = vor.u32 %v3885_v27, %v3483_v26  ;;  %v3862_v43 = vld [vmem:[#allocation5 + $0x104] sm:$0xf] }
  0xfb   :  { %2119 = vmatpush.bf16.msra.mxu1 %v3384_v42  ;;  %v3272_v42 = vor.u32 %v3830_v25, %v3269_v29 }
  0xfc   :  { %v1456_v22 = vpop.f32.mrf.mxu2 }
  0xfd   :  { %2107 = vmatpush.bf16.msrb.mxu3 %v3312_v48  ;;  %v1457_v39 = vadd.f32 %v1456_v22, %v1444_v21  ;;  %v3336_v48 = vor.u32 %v3846_v19, %v3333_v40  ;;  %v3491_v21 = vld [vmem:[#allocation5 + $0x1c0] sm:$0xf]  ;;  %v3887_v22 = vld [vmem:[#allocation5 + $0x1c4] sm:$0xf0] }
  0xfe   :  { %v1469_v46 = vpop.f32.mrf.mxu0  ;;  %2085 = vmatpush.bf16.msrb.mxu2 %v3404_v28  ;;  %v3492_v23 = vor.u32 %v3887_v22, %v3491_v21  ;;  %v3475_v19 = vld [vmem:[#allocation5 + $0x1a0] sm:$0xf]  ;;  %v3883_v40 = vld [vmem:[#allocation5 + $0x1a4] sm:$0xf0]  ;;  %v3881_v28 = vld [vmem:[#allocation5 + $0x194] sm:$0xf0] }
  0xff   :  { %2120 = vmatpush.bf16.msra.mxu1 %v3376_v50  ;;  %v1445_v47 = vpop.f32.mrf.mxu3  ;;  %v1470_v57 = vadd.f32 %v1469_v46, %v1457_v39  ;;  %v3408_v39 = vor.u32 %v3864_v31, %v3405_v32  ;;  %v3476_v46 = vor.u32 %v3883_v40, %v3475_v19  ;;  %v302_v22 = vperm.slane %v4188_v53, 3  ;;  %v3461_v31 = vld [vmem:[#allocation5 + $0x188] sm:$0xf0] }
 0x100   :  { %v3400_v47 = vor.u32 %v3862_v43, %v3397_v44 }
 0x101   :  { %2108 = vmatpush.bf16.msrb.mxu3 %v3304_v30  ;;  %v1656_v50 = vmax.f32 %v1470_v57, 0.0  ;;  %v3396_v30 = vor.u32 %v3863_v54, %v3395_v52 }
 0x103   :  { %2121 = vmatpush.bf16.msra.mxu1 %v3368_v62  ;;  %v1660_v56 = vpack.c.bf16 %v1656_v50, %v1656_v50  ;;  %2086 = vmatpush.bf16.msrb.mxu2 %v3396_v30  ;;  %v3445_v62 = vld [vmem:[#allocation5 + $0x168] sm:$0xf0]  ;;  %v3879_v30 = vld [vmem:[#allocation5 + $0x184] sm:$0xf0] }
 0x104   :  { %v1458_v49 = vpop.f32.mrf.mxu2  ;;  %v3448_v63 = vor.u32 %v3874_v36, %v3445_v62  ;;  %v3520_v36 = vor.u32 %v3892_v59, %v3517_v60 }
 0x105   :  { %2109 = vmatpush.bf16.msrb.mxu3 %v3296_v2  ;;  %2074 = vmatmul.bf16.vlgmr.msrb.gmra.mxu1 %v1660_v56  ;;  %v3872_v2 = vld [vmem:[#allocation5 + $0x154] sm:$0xf]  ;;  %v3467_v49 = vld [vmem:[#allocation5 + $0x190] sm:$0xf] }
 0x106   :  { %v1471_v58 = vpop.f32.mrf.mxu0  ;;  %v3440_v5 = vor.u32 %v3872_v2, %v3437_v4  ;;  %v3468_v50 = vor.u32 %v3881_v28, %v3467_v49  ;;  %v3509_v2 = vld [vmem:[#allocation5 + $0x1e8] sm:$0xf0] }
 0x107   :  { %2122 = vmatpush.bf16.msra.mxu1 %v3360_v9  ;;  %2131 = vmatpush.bf16.msra.mxu2 %v3456_v61 }
 0x109   :  { %2110 = vmatpush.bf16.msrb.mxu3 %v3288_v13 }
 0x10b   :  { %2123 = vmatpush.bf16.msra.mxu1 %v3352_v45  ;;  %2132 = vmatpush.bf16.msra.mxu2 %v3448_v63  ;;  %v3421_v45 = vld [vmem:[#allocation5 + $0x138] sm:$0xf0] }
 0x10c   :  { %v3424_v20 = vor.u32 %v3868_v16, %v3421_v45  ;;  %v3882_v45 = vld [vmem:[#allocation5 + $0x1a4] sm:$0xf] }
 0x10d   :  { %2111 = vmatpush.bf16.msrb.mxu3 %v3280_v7  ;;  %v3413_v7 = vld [vmem:[#allocation5 + $0x128] sm:$0xf0] }
 0x10e   :  { %v3416_v25 = vor.u32 %v3866_v24, %v3413_v7  ;;  %v3469_v24 = vld [vmem:[#allocation5 + $0x198] sm:$0xf0] }
 0x10f   :  { %2124 = vmatpush.bf16.msra.mxu1 %v3344_v37  ;;  %2133 = vmatpush.bf16.msra.mxu2 %v3440_v5 }
 0x111   :  { %2112 = vmatpush.bf16.msrb.mxu3 %v3272_v42  ;;  %v1482_v3 = vpop.f32.mrf.mxu1 }
 0x112   :  { %v4206_v35 = vpop.f32.mrf.mxu0  ;;  %v1483_v51 = vadd.f32 %v1482_v3, %v301_v33 }
 0x113   :  { %2125 = vmatpush.bf16.msra.mxu1 %v3336_v48  ;;  %2134 = vmatpush.bf16.msra.mxu2 %v3432_v12 }
 0x114   :  { %2113 = vmatmul.bf16.vlgmr.msrb.gmra.mxu3 %v4202_v38  ;;  %v3516_v38 = vor.u32 %v3893_v1, %v3515_v0  ;;  %v3890_v1 = vld [vmem:[#allocation5 + $0x1e4] sm:$0xf] }
 0x115   :  { %v3512_v4 = vor.u32 %v3890_v1, %v3509_v2  ;;  %v3901_v2 = vld [vmem:[#allocation7 + $0x38] sm:$0xff] }
 0x116   :  { %2092 = vmatpush.bf16.msra.mxu0 %v3516_v38  ;;  %2126 = vmatmul.bf16.vlgmr.msra.gmra.mxu1 %v1660_v56  ;;  %v3459_v56 = vld [vmem:[#allocation5 + $0x180] sm:$0xf] }
 0x117   :  { %v1495_v9 = vpop.f32.mrf.mxu3  ;;  %2135 = vmatpush.bf16.msra.mxu2 %v3424_v20  ;;  %v3460_v58 = vor.u32 %v3879_v30, %v3459_v56  ;;  %v3477_v20 = vld [vmem:[#allocation5 + $0x1a8] sm:$0xf0]  ;;  %2293 = vmatpush.bf16.msra.mxu3 %v3901_v2 }
 0x118   :  { %v1496_v48 = vadd.f32 %v1495_v9, %v1483_v51  ;;  %v3504_v9 = vor.u32 %v3888_v41, %v3501_v6  ;;  %v3480_v21 = vor.u32 %v3882_v45, %v3477_v20  ;;  %v3896_v41 = vld [vmem:[#allocation7 + $0x10] sm:$0xff] }
 0x119   :  { %v1484_v18 = vpop.f32.mrf.mxu1  ;;  %v3908_v6 = vld [vmem:[#allocation7 + $0x70] sm:$0xff] }
 0x11a   :  { %2093 = vmatpush.bf16.msra.mxu0 %v3508_v10  ;;  %v1510_v13 = vpop.f32.mrf.mxu0  ;;  %v1509_v52 = vadd.f32 %v4206_v35, %v1496_v48  ;;  %v3485_v18 = vld [vmem:[#allocation5 + $0x1b8] sm:$0xf0]  ;;  %v3916_v20 = vld [vmem:[%s4269_s7 + $0x30] sm:$0xff] }
 0x11b   :  { %2136 = vmatpush.bf16.msra.mxu2 %v3416_v25  ;;  %v3886_v13 = vld [vmem:[#allocation5 + $0x1c4] sm:$0xf] }
 0x11c   :  { %v1521_v17 = vpop.f32.mrf.mxu2  ;;  %v3496_v15 = vor.u32 %v3886_v13, %v3493_v14  ;;  %v3905_v13 = vld [vmem:[#allocation7 + $0x58] sm:$0xff]  ;;  %v3904_v14 = vld [vmem:[#allocation7 + $0x50] sm:$0xff] }
 0x11d   :  { %v1522_v61 = vadd.f32 %v1521_v17, %v1509_v52  ;;  %v3884_v17 = vld [vmem:[#allocation5 + $0x1b4] sm:$0xf]  ;;  %v1727_v52 = vld [vmem:[%s4266_s4] sm:$0x3] }
 0x11e   :  { %2094 = vmatpush.bf16.msra.mxu0 %v3500_v55  ;;  %v3488_v55 = vor.u32 %v3884_v17, %v3485_v18  ;;  %v3902_v18 = vld [vmem:[#allocation7 + $0x40] sm:$0xff] }
 0x11f   :  { %v1497_v29 = vpop.f32.mrf.mxu3  ;;  %2137 = vmatpush.bf16.msra.mxu2 %v3408_v39 }
 0x120   :  { %v3878_v29 = vld [vmem:[#allocation5 + $0x184] sm:$0xf] }
 0x121   :  { %v3464_v32 = vor.u32 %v3878_v29, %v3461_v31 }
 0x122   :  { %2095 = vmatpush.bf16.msra.mxu0 %v3492_v23  ;;  %v1560_v37 = vpop.f32.mrf.mxu0  ;;  %v3880_v23 = vld [vmem:[#allocation5 + $0x194] sm:$0xf] }
 0x123   :  { %2138 = vmatpush.bf16.msra.mxu2 %v3400_v47  ;;  %v3472_v7 = vor.u32 %v3880_v23, %v3469_v24 }
 0x124   :  { %v1523_v42 = vpop.f32.mrf.mxu2 }
 0x126   :  { %2096 = vmatpush.bf16.msra.mxu0 %v3484_v34 }
 0x12a   :  { %2097 = vmatpush.bf16.msra.mxu0 %v3476_v46  ;;  %v1562_v57 = vpop.f32.mrf.mxu0 }
 0x12e   :  { %2098 = vmatpush.bf16.msra.mxu0 %v3468_v50 }
 0x131   :  { %v1534_v54 = vpop.f32.mrf.mxu1 }
 0x132   :  { %2099 = vmatpush.bf16.msra.mxu0 %v3460_v58  ;;  %v1535_v62 = vadd.f32 %v1534_v54, %v1522_v61  ;;  %v1729_v54 = vperm.slane %v1727_v52, 0  ;;  %v1730_v61 = vperm.slane %v1727_v52, 1 }
 0x136   :  { %2144 = vmatpush.bf16.msrb.mxu0 %v3520_v36 }
 0x137   :  { %v1547_v0 = vpop.f32.mrf.mxu3 }
 0x138   :  { %v1586_v63 = vpop.f32.mrf.mxu0  ;;  %v1548_v3 = vadd.f32 %v1547_v0, %v1535_v62 }
 0x139   :  { %v1536_v38 = vpop.f32.mrf.mxu1 }
 0x13a   :  { %v1561_v35 = vadd.f32 %v1560_v37, %v1548_v3  ;;  %2145 = vmatpush.bf16.msrb.mxu0 %v3512_v4  ;;  %v3900_v3 = vld [vmem:[#allocation7 + $0x30] sm:$0xff]  ;;  %v3899_v38 = vld [vmem:[#allocation7 + $0x28] sm:$0xff]  ;;  %v3898_v4 = vld [vmem:[#allocation7 + $0x20] sm:$0xff] }
 0x13b   :  { %2294 = vmatpush.bf16.msra.mxu3 %v3900_v3 }
 0x13c   :  { %v1573_v5 = vpop.f32.mrf.mxu2  ;;  %v1657_v8 = vmax.f32 %v1561_v35, 0.0  ;;  %v3909_v35 = vld [vmem:[#allocation7 + $0x78] sm:$0xff] }
 0x13d   :  { %v1574_v25 = vadd.f32 %v1573_v5, %v302_v22  ;;  %v3897_v5 = vld [vmem:[#allocation7 + $0x18] sm:$0xff]  ;;  %2306 = vmatpush.bf16.msrb.mxu1 %v3909_v35 }
 0x13e   :  { %v1661_v10 = vpack.c.bf16 %v1657_v8, %v1657_v8  ;;  %2146 = vmatpush.bf16.msrb.mxu0 %v3504_v9  ;;  %v3895_v8 = vld [vmem:[#allocation7 + $0x8] sm:$0xff] }
 0x13f   :  { %v1549_v12 = vpop.f32.mrf.mxu3  ;;  %v1587_v27 = vadd.f32 %v1586_v63, %v1574_v25  ;;  %2295 = vmatpush.bf16.msra.mxu3 %v3899_v38  ;;  %v3907_v9 = vld [vmem:[#allocation7 + $0x68] sm:$0xff] }
 0x140   :  { %v1588_v11 = vpop.f32.mrf.mxu0  ;;  %2087 = vmatmul.bf16.vlgmr.msrb.gmra.mxu2 %v1661_v10  ;;  %v3906_v12 = vld [vmem:[#allocation7 + $0x60] sm:$0xff] }
 0x141   :  { %2307 = vmatpush.bf16.msrb.mxu1 %v3908_v6  ;;  %v3894_v11 = vld [vmem:[#allocation7] sm:$0xff] }
 0x142   :  { %2147 = vmatpush.bf16.msrb.mxu0 %v3496_v15 }
 0x143   :  { %2296 = vmatpush.bf16.msra.mxu3 %v3898_v4 }
 0x144   :  { %v1575_v16 = vpop.f32.mrf.mxu2 }
 0x145   :  { %2308 = vmatpush.bf16.msrb.mxu1 %v3907_v9  ;;  %v3903_v16 = vld [vmem:[#allocation7 + $0x48] sm:$0xff] }
 0x146   :  { %2148 = vmatpush.bf16.msrb.mxu0 %v3488_v55  ;;  %v3917_v55 = vld [vmem:[%s4269_s7 + $0x38] sm:$0xff] }
 0x147   :  { %2297 = vmatpush.bf16.msra.mxu3 %v3897_v5  ;;  %2389 = vmatpush.bf16.msrb.mxu2 %v3917_v55 }
 0x149   :  { %2309 = vmatpush.bf16.msrb.mxu1 %v3906_v12 }
 0x14a   :  { %2149 = vmatpush.bf16.msrb.mxu0 %v3480_v21  ;;  %v3915_v21 = vld [vmem:[%s4269_s7 + $0x28] sm:$0xff] }
 0x14b   :  { %2298 = vmatpush.bf16.msra.mxu3 %v3896_v41  ;;  %2390 = vmatpush.bf16.msrb.mxu2 %v3916_v20 }
 0x14d   :  { %2310 = vmatpush.bf16.msrb.mxu1 %v3905_v13 }
 0x14e   :  { %2150 = vmatpush.bf16.msrb.mxu0 %v3472_v7  ;;  %v3914_v7 = vld [vmem:[%s4269_s7 + $0x20] sm:$0xff] }
 0x14f   :  { %2299 = vmatpush.bf16.msra.mxu3 %v3895_v8  ;;  %2391 = vmatpush.bf16.msrb.mxu2 %v3915_v21 }
 0x150   :  { %2139 = vmatmul.bf16.vlgmr.msra.gmra.mxu2 %v1661_v10 }
 0x151   :  { %v1599_v26 = vpop.f32.mrf.mxu1  ;;  %2311 = vmatpush.bf16.msrb.mxu1 %v3904_v14 }
 0x152   :  { %2151 = vmatpush.bf16.msrb.mxu0 %v3464_v32  ;;  %v1600_v33 = vadd.f32 %v1599_v26, %v1587_v27 }
 0x153   :  { %2300 = vmatpush.bf16.msra.mxu3 %v3894_v11  ;;  %2392 = vmatpush.bf16.msrb.mxu2 %v3914_v7 }
 0x155   :  { %2312 = vmatpush.bf16.msrb.mxu1 %v3903_v16 }
 0x157   :  { %v1612_v34 = vpop.f32.mrf.mxu3  ;;  %v1638_v37 = vpop.f32.mrf.mxu0 }
 0x158   :  { %v1613_v39 = vadd.f32 %v1612_v34, %v1600_v33 }
 0x159   :  { %v1601_v19 = vpop.f32.mrf.mxu1  ;;  %2313 = vmatpush.bf16.msrb.mxu1 %v3902_v18 }
 0x15a   :  { %v3912_v19 = vld [vmem:[%s4269_s7 + $0x10] sm:$0xff] }
 0x15c   :  { %v1625_v40 = vpop.f32.mrf.mxu2 }
 0x15d   :  { %v1626_v53 = vadd.f32 %v1625_v40, %v1613_v39  ;;  %v3913_v39 = vld [vmem:[%s4269_s7 + $0x18] sm:$0xff]  ;;  %v3911_v40 = vld [vmem:[%s4269_s7 + $0x8] sm:$0xff] }
 0x15e   :  { %2393 = vmatpush.bf16.msrb.mxu2 %v3913_v39 }
 0x15f   :  { %v1614_v42 = vpop.f32.mrf.mxu3  ;;  %v1640_v43 = vpop.f32.mrf.mxu0  ;;  %v1639_v44 = vadd.f32 %v1638_v37, %v1626_v53  ;;  %v3910_v53 = vld [vmem:[%s4269_s7] sm:$0xff] }
 0x160   :  { %v3921_v42 = vld [vmem:[%s4271_s9 + $0x18] sm:$0xff]  ;;  %v3920_v43 = vld [vmem:[%s4271_s9 + $0x10] sm:$0xff] }
 0x161   :  { %v1651_v51 = vpop.f32.mrf.mxu1 }
 0x162   :  { %v1652_v46 = vadd.f32 %v1651_v51, %v1639_v44  ;;  %2394 = vmatpush.bf16.msrb.mxu2 %v3912_v19  ;;  %v3919_v44 = vld [vmem:[%s4271_s9 + $0x8] sm:$0xff] }
 0x164   :  { %v1627_v47 = vpop.f32.mrf.mxu2  ;;  %v1658_v48 = vmax.f32 %v1652_v46, 0.0  ;;  %v3932_v46 = vld [vmem:[%s4268_s6] ss:$0 sm:$0xff] }
 0x166   :  { %v1662_v57 = vpack.c.bf16 %v1658_v48, %v1658_v48  ;;  %2395 = vmatpush.bf16.msrb.mxu2 %v3911_v40 }
 0x168   :  { %2100 = vmatmul.bf16.vlgmr.msra.gmra.mxu0 %v1662_v57 }
 0x169   :  { %v1653_v49 = vpop.f32.mrf.mxu1  ;;  %2448 = vmatpush.bf16.msra.mxu0 %v3921_v42 }
 0x16a   :  { %2396 = vmatpush.bf16.msrb.mxu2 %v3910_v53 }
 0x16d   :  { %2449 = vmatpush.bf16.msra.mxu0 %v3920_v43 }
 0x171   :  { %2450 = vmatpush.bf16.msra.mxu0 %v3919_v44 }
 0x177   :  { %v2062_v28 = vpop.f32.mrf.mxu3 }
 0x178   :  { %2152 = vmatmul.bf16.vlgmr.msrb.gmra.mxu0 %v1662_v57  ;;  %v2063_v56 = vadd.f32 %v2062_v28, %v1729_v54  ;;  %v3918_v54 = vld [vmem:[%s4271_s9] sm:$0xff] }
 0x179   :  { %2451 = vmatpush.bf16.msra.mxu0 %v3918_v54 }
 0x17f   :  { %v2064_v50 = vpop.f32.mrf.mxu3 }
 0x182   :  { %v2075_v30 = vpop.f32.mrf.mxu1 }
 0x183   :  { %v2076_v58 = vadd.f32 %v2075_v30, %v2063_v56  ;;  %v3933_v56 = vld [vmem:[%s4270_s8] ss:$0 sm:$0xff] }
 0x18a   :  { %v2077_v60 = vpop.f32.mrf.mxu1 }
 0x193   :  { %v2127_v63 = vpop.f32.mrf.mxu1 }
 0x197   :  { %v2114_v59 = vpop.f32.mrf.mxu3 }
 0x198   :  { %v2115_v62 = vadd.f32 %v2114_v59, %v1730_v61 }
 0x19a   :  { %v2128_v0 = vadd.f32 %v2127_v63, %v2115_v62 }
 0x19b   :  { %v2129_v1 = vpop.f32.mrf.mxu1 }
 0x19f   :  { %v2116_v36 = vpop.f32.mrf.mxu3 }
 0x1a0   :  { %v3934_v36 = vld [vmem:[%s4272_s10] ss:$0 sm:$0xff] }
 0x1c3   :  { %v2088_v10 = vpop.f32.mrf.mxu2 }
 0x1c4   :  { %v2089_v22 = vadd.f32 %v2088_v10, %v2076_v58 }
 0x1cb   :  { %v2090_v15 = vpop.f32.mrf.mxu2 }
 0x1d3   :  { %v2140_v17 = vpop.f32.mrf.mxu2 }
 0x1d4   :  { %v2141_v29 = vadd.f32 %v2140_v17, %v2128_v0 }
 0x1db   :  { %v2142_v45 = vpop.f32.mrf.mxu2 }
 0x1e5   :  { %v2101_v23 = vpop.f32.mrf.mxu0 }
 0x1e6   :  { %v2102_v24 = vadd.f32 %v2101_v23, %v2089_v22 }
 0x1e8   :  { %v2157_v25 = vmax.f32 %v2102_v24, 0.0 }
 0x1ea   :  { %v2159_v26 = vpack.c.bf16 %v2157_v25, %v2157_v25 }
 0x1ec   :  { %2301 = vmatmul.bf16.vlgmr.msra.gmra.mxu3 %v2159_v26 }
 0x1ed   :  { %v2103_v27 = vpop.f32.mrf.mxu0 }
 0x1f5   :  { %v2153_v31 = vpop.f32.mrf.mxu0 }
 0x1f6   :  { %v2154_v32 = vadd.f32 %v2153_v31, %v2141_v29 }
 0x1f8   :  { %v2158_v33 = vmax.f32 %v2154_v32, 0.0 }
 0x1fa   :  { %v2160_v34 = vpack.c.bf16 %v2158_v33, %v2158_v33 }
 0x1fc   :  { %2314 = vmatmul.bf16.vlgmr.msrb.gmra.mxu1 %v2160_v34 }
 0x1fd   :  { %v2155_v37 = vpop.f32.mrf.mxu0 }
 0x26f   :  { %v2302_v51 = vpop.f32.mrf.mxu3 }
 0x270   :  { %v2303_v48 = vadd.f32 %v3932_v46, %v2302_v51 }
 0x277   :  { %v2304_v47 = vpop.f32.mrf.mxu3 }
 0x279   :  { %v2315_v57 = vpop.f32.mrf.mxu1 }
 0x27a   :  { %v2316_v49 = vadd.f32 %v2315_v57, %v2303_v48 }
 0x27c   :  { %v2319_v28 = vmax.f32 %v2316_v49, 0.0 }
 0x27e   :  { %v2320_v50 = vpack.c.bf16 %v2319_v28, %v2319_v28 }
 0x280   :  { %2397 = vmatmul.bf16.vlgmr.msrb.gmra.mxu2 %v2320_v50 }
 0x281   :  { %v2317_v52 = vpop.f32.mrf.mxu1 }
 0x303   :  { %v2398_v30 = vpop.f32.mrf.mxu2 }
 0x304   :  { %v2399_v58 = vadd.f32 %v3933_v56, %v2398_v30 }
 0x306   :  { %v2402_v59 = vmax.f32 %v2399_v58, 0.0 }
 0x308   :  { %v2403_v60 = vpack.c.bf16 %v2402_v59, %v2402_v59 }
 0x30a   :  { %3633 = vmatmul.msk.bf16.vlgmr.msra.gmra.mxu0 %vm2440_vm1, %v2403_v60 }
 0x30b   :  { %v2400_v61 = vpop.f32.mrf.mxu2 }
 0x387   :  { %v2453_v62 = vpop.f32.mrf.mxu0 }
 0x388   :  { %v2454_v63 = vadd.f32 %v3934_v36, %v2453_v62 }
 0x38a   :  { %v2457_v0 = vpack.c.bf16 %v2454_v63, %v2454_v63 }
 0x38c   :  { %2458 = vst [vmem:[#allocation8] sm:$0xf] %v2457_v0 }
 0x38d   :  { %2469 = dma.vmem_to_hbm [thread:$0]  %s2465_s15, 64, %s2467_s1, [#allocation4]  }
 0x38f   :  { %v2455_v1 = vpop.f32.mrf.mxu0 }
 0x390   :  { %4035 = dma.done.wait [#allocation4], 64  }
 0x391   :  { %4036 = vsyncadd [#allocation4], 4294967232 }
 0x392   :  { %2474 = vsyncpa [#allocation3], 1 }
 0x393   :  { %2475 = vsyncpa [#allocation6], 1 }
 0x394   :  { %2476 = vsyncpa [#allocation4], 1 }

</bundles_post_ra>
